<compile_context>
chip_gen: v7x
topology: tpu7x:2x2x1
jax: 0.10.0
libtpu: 0.0.40
codegen_flags: <defaults>
</compile_context>

<pallas_src>
import jax
import jax.numpy as jnp
from jax import lax
from jax.experimental import pallas as pl
from jax.experimental.pallas import tpu as pltpu

MXU_INPUT_DTYPE = jnp.float32   # flip to jnp.bfloat16 for ~3x MXU throughput (see note above)


# ----------------------------------------------------------------------------
# Fused kernel
# ----------------------------------------------------------------------------
def _make_fused_kernel(plan, batch, eps=1e-5, neg_slope=0.01):
    """plan: static per-layer dicts {ksize, stride, c_in, c_out, l_in, l_out, bn_act}."""
    n_params = sum(3 if cfg["bn_act"] else 2 for cfg in plan)
    n_layers = len(plan)

    def kernel(*refs):
        x_ref = refs[0]
        p_refs = refs[1:1 + n_params]
        o_ref = refs[1 + n_params]
        s_refs = refs[2 + n_params:]

        pi = 0
        si = 0
        prev_ref = x_ref                                     # flat (B*l_in, c_in) activations
        for li, cfg in enumerate(plan):
            k, s = cfg["ksize"], cfg["stride"]
            c_in, c_out = cfg["c_in"], cfg["c_out"]
            l_in, l_out = cfg["l_in"], cfg["l_out"]

            w = p_refs[pi][...]; pi += 1                     # (k*c_in, c_out), tap-major rows
            if cfg["bn_act"]:
                gamma = p_refs[pi][...]; pi += 1             # (1, c_out)
                beta = p_refs[pi][...]; pi += 1              # (1, c_out)
            else:
                bias = p_refs[pi][...]; pi += 1              # (1, c_out)

            # ---- im2col gather: strided sublane reads -> one lane-dense MXU operand ----
            if k == 1 and s == 1:
                rows = prev_ref[...]                         # identity gather for the 1x1 conv
            else:
                im_ref = s_refs[si]; si += 1                 # (B*l_out, k*c_in) scratch
                for bb in range(batch):
                    for j in range(k):
                        start = bb * l_in + j                # static; stays inside batch bb
                        if s > 1:
                            v = prev_ref[pl.ds(start, l_out, stride=s), :]
                        else:
                            v = prev_ref[pl.ds(start, l_out), :]
                        im_ref[bb * l_out:(bb + 1) * l_out,
                               j * c_in:(j + 1) * c_in] = v
                rows = im_ref[...]

            # ---- fused-tap convolution: a single MXU matmul per layer ----
            acc = jnp.dot(rows.astype(MXU_INPUT_DTYPE), w.astype(MXU_INPUT_DTYPE),
                          preferred_element_type=jnp.float32)

            if cfg["bn_act"]:
                # Conv bias skipped: exactly cancelled by BN mean subtraction (training mode).
                # One-pass BatchNorm1d batch stats, folded into one scale/shift FMA.
                inv_n = 1.0 / float(batch * l_out)
                s1 = jnp.sum(acc, axis=0, keepdims=True)
                s2 = jnp.sum(acc * acc, axis=0, keepdims=True)
                mean = s1 * inv_n
                var = jnp.maximum(s2 * inv_n - mean * mean, 0.0)
                scale = lax.rsqrt(var + eps) * gamma
                shift = beta - mean * scale
                acc = acc * scale + shift
                acc = jnp.maximum(acc, neg_slope * acc)      # LeakyReLU(0.01), single VPU max
            else:
                acc = acc + bias                             # final bare Conv1d keeps its bias

            if li < n_layers - 1:
                act_ref = s_refs[si]; si += 1                # (B*l_out, c_out) stays in VMEM
                act_ref[...] = acc
                prev_ref = act_ref
            else:
                o_ref[...] = acc.astype(o_ref.dtype)

    return kernel


# ----------------------------------------------------------------------------
# Host wrapper
# ----------------------------------------------------------------------------
def embedding_nn_forward(x_ncl, params):
    """x_ncl: (B, C_in, L) PyTorch NCL layout. Returns (B, len_embedding, L_out)."""
    B, c_in0, L0 = x_ncl.shape
    # NCL -> channels-last, flatten batch into rows (host-side layout plumbing, free).
    x_flat = jnp.transpose(x_ncl, (0, 2, 1)).reshape(B * L0, c_in0).astype(jnp.float32)

    # Lane-pad very narrow channel counts (the 1-channel input) up to 8 lanes; the
    # matching weight rows are zero so the result is unchanged.
    c_prev = max(c_in0, 8)
    if c_prev != c_in0:
        x_flat = jnp.pad(x_flat, ((0, 0), (0, c_prev - c_in0)))

    plan = []
    flat_inputs = []
    scratch_shapes = []
    L = L0
    c_out = c_in0
    flops = 0
    transcendentals = 0
    n_layers = len(params)

    for idx, p in enumerate(params):
        k, s = p["ksize"], p["stride"]
        c_in, c_out = p["w"].shape[1], p["w"].shape[2]
        l_out = (L - k) // s + 1
        assert l_out >= 1, "input too short for this conv layer"

        w = jnp.asarray(p["w"], jnp.float32)                 # (k, c_in, c_out)
        if c_prev != c_in:                                   # zero rows for padded input lanes
            w = jnp.pad(w, ((0, 0), (0, c_prev - c_in), (0, 0)))

        plan.append(dict(ksize=k, stride=s, c_in=c_prev, c_out=c_out,
                         l_in=L, l_out=l_out, bn_act=p["do_bn_act"]))

        flat_inputs.append(w.reshape(k * c_prev, c_out))     # tap-major fused weight
        if p["do_bn_act"]:
            flat_inputs.append(jnp.asarray(p["gamma"], jnp.float32).reshape(1, c_out))
            flat_inputs.append(jnp.asarray(p["beta"], jnp.float32).reshape(1, c_out))
        else:
            flat_inputs.append(jnp.asarray(p["b"], jnp.float32).reshape(1, c_out))

        if not (k == 1 and s == 1):
            scratch_shapes.append(pltpu.VMEM((B * l_out, k * c_prev), jnp.float32))  # im2col
        if idx < n_layers - 1:
            scratch_shapes.append(pltpu.VMEM((B * l_out, c_out), jnp.float32))       # activations

        flops += 2 * (B * l_out) * (k * c_prev) * c_out
        if p["do_bn_act"]:
            flops += 10 * B * l_out * c_out
            transcendentals += c_out
        L = l_out
        c_prev = c_out

    n_out_rows = B * L
    bytes_accessed = 4 * (int(x_flat.size)
                          + sum(int(a.size) for a in flat_inputs)
                          + n_out_rows * c_out)

    kernel = _make_fused_kernel(plan, batch=B)
    vmem = pl.BlockSpec(memory_space=pltpu.MemorySpace.VMEM)
    out_flat = pl.pallas_call(
        kernel,
        out_shape=jax.ShapeDtypeStruct((n_out_rows, c_out), jnp.float32),
        in_specs=[vmem] * (1 + len(flat_inputs)),
        out_specs=vmem,
        scratch_shapes=scratch_shapes,
        cost_estimate=pl.CostEstimate(flops=int(flops),
                                      transcendentals=int(transcendentals),
                                      bytes_accessed=int(bytes_accessed)),
        compiler_params=pltpu.CompilerParams(vmem_limit_bytes=32 * 1024 * 1024),
    )(x_flat, *flat_inputs)

    # flat rows -> (B, L_out, C_emb) -> PyTorch NCL layout (host-side, free).
    return jnp.transpose(out_flat.reshape(B, L, c_out), (0, 2, 1))


# ----------------------------------------------------------------------------
# Synthetic parameters matching EmbeddingNN's layer shapes
# ----------------------------------------------------------------------------
def init_params(key, *, num_in_channels, num_hidden, len_embedding, len_last_kernel):
    cfgs = [
        # (ksize, stride, C_in, C_out, conv->BN->LeakyReLU?)
        (3, 2, num_in_channels, num_hidden, True),
        (3, 2, num_hidden, num_hidden, True),
        (3, 2, num_hidden, num_hidden, True),
        (3, 2, num_hidden, num_hidden, True),
        (len_last_kernel, 1, num_hidden, num_hidden, True),
        (1, 1, num_hidden, len_embedding, False),   # final Conv1d, no BN / act
    ]
    params = []
    for (k, s, cin, cout, bn) in cfgs:
        key, kw, kb = jax.random.split(key, 3)
        bound = 1.0 / float((cin * k) ** 0.5)       # PyTorch Conv1d default init bound
        w = jax.random.uniform(kw, (k, cin, cout), jnp.float32, -bound, bound)
        b = jax.random.uniform(kb, (cout,), jnp.float32, -bound, bound)
        gamma = jnp.ones((cout,), jnp.float32)      # BatchNorm1d affine init
        beta = jnp.zeros((cout,), jnp.float32)
        params.append(dict(w=w, b=b, gamma=gamma, beta=beta,
                           ksize=k, stride=s, do_bn_act=bn))
    return params


# ----------------------------------------------------------------------------
# Pure-JAX reference (independent formulation) for correctness checking
# ----------------------------------------------------------------------------
def _reference_forward(x_ncl, params, eps=1e-5, neg_slope=0.01):
    x = jnp.transpose(x_ncl, (0, 2, 1)).astype(jnp.float32)   # (B, L, C)
    for p in params:
        k, s = p["ksize"], p["stride"]
        B, L, C = x.shape
        c_out = p["w"].shape[2]
        l_out = (L - k) // s + 1
        y = jnp.zeros((B, l_out, c_out), jnp.float32)
        for j in range(k):
            xs = lax.slice(x, (0, j, 0), (B, j + s * (l_out - 1) + 1, C), (1, s, 1))
            y = y + jnp.einsum("blc,cd->bld", xs, p["w"][j])
        y = y + p["b"]
        if p["do_bn_act"]:
            mean = jnp.mean(y, axis=(0, 1), keepdims=True)
            var = jnp.mean((y - mean) ** 2, axis=(0, 1), keepdims=True)
            y = (y - mean) * lax.rsqrt(var + eps)
            y = y * p["gamma"] + p["beta"]
            y = jnp.where(y > 0, y, neg_slope * y)
        x = y
    return jnp.transpose(x, (0, 2, 1))


if __name__ == "__main__":
    # Small shapes consistent with the module's constructor arguments.
    BATCH = 2
    INPUT_LEN = 128
    NUM_IN_CHANNELS = 1
    NUM_HIDDEN_CHANNELS = 32
    LEN_EMBEDDING = 16
    LEN_LAST_KERNEL = 4
    assert INPUT_LEN // 2 ** 4 > 1, \
        "input length must be long enough for number of downsizing layers"

    key = jax.random.PRNGKey(0)
    key, kx = jax.random.split(key)
    x = jax.random.normal(kx, (BATCH, NUM_IN_CHANNELS, INPUT_LEN), jnp.float32)

    params = init_params(key,
                         num_in_channels=NUM_IN_CHANNELS,
                         num_hidden=NUM_HIDDEN_CHANNELS,
                         len_embedding=LEN_EMBEDDING,
                         len_last_kernel=LEN_LAST_KERNEL)

    out = embedding_nn_forward(x, params)
    out = jax.block_until_ready(out)

    # L: 128 -> 63 -> 31 -> 15 -> 7 -> 4 (k=4) -> 4 (k=1)
    assert out.shape == (BATCH, LEN_EMBEDDING, 4), out.shape
    assert bool(jnp.all(jnp.isfinite(out)))

    ref = jax.block_until_ready(_reference_forward(x, params))
    max_err = float(jnp.max(jnp.abs(out - ref)))
    assert max_err < 2e-3, f"mismatch vs reference: max abs err {max_err}"

    print("KERNEL_OK")
</pallas_src>

<mosaic_0001>
module attributes {stable_mosaic.version = 11 : i64} {
  func.func @kernel(%arg0: memref<256x8xf32, #tpu.memory_space<vmem>>, %arg1: memref<24x32xf32, #tpu.memory_space<vmem>>, %arg2: memref<1x32xf32, #tpu.memory_space<vmem>>, %arg3: memref<1x32xf32, #tpu.memory_space<vmem>>, %arg4: memref<96x32xf32, #tpu.memory_space<vmem>>, %arg5: memref<1x32xf32, #tpu.memory_space<vmem>>, %arg6: memref<1x32xf32, #tpu.memory_space<vmem>>, %arg7: memref<96x32xf32, #tpu.memory_space<vmem>>, %arg8: memref<1x32xf32, #tpu.memory_space<vmem>>, %arg9: memref<1x32xf32, #tpu.memory_space<vmem>>, %arg10: memref<96x32xf32, #tpu.memory_space<vmem>>, %arg11: memref<1x32xf32, #tpu.memory_space<vmem>>, %arg12: memref<1x32xf32, #tpu.memory_space<vmem>>, %arg13: memref<128x32xf32, #tpu.memory_space<vmem>>, %arg14: memref<1x32xf32, #tpu.memory_space<vmem>>, %arg15: memref<1x32xf32, #tpu.memory_space<vmem>>, %arg16: memref<32x16xf32, #tpu.memory_space<vmem>>, %arg17: memref<1x16xf32, #tpu.memory_space<vmem>>, %arg18: memref<8x16xf32, #tpu.memory_space<vmem>>, %arg19: memref<126x24xf32, #tpu.memory_space<vmem>>, %arg20: memref<126x32xf32, #tpu.memory_space<vmem>>, %arg21: memref<62x96xf32, #tpu.memory_space<vmem>>, %arg22: memref<62x32xf32, #tpu.memory_space<vmem>>, %arg23: memref<30x96xf32, #tpu.memory_space<vmem>>, %arg24: memref<30x32xf32, #tpu.memory_space<vmem>>, %arg25: memref<14x96xf32, #tpu.memory_space<vmem>>, %arg26: memref<14x32xf32, #tpu.memory_space<vmem>>, %arg27: memref<8x128xf32, #tpu.memory_space<vmem>>, %arg28: memref<8x32xf32, #tpu.memory_space<vmem>>) attributes {dimension_semantics = [], scalar_prefetch = 0 : i64, scratch_operands = 10 : i64, tpu.core_type = #tpu.core_type<tc>} {
    %c0 = arith.constant 0 : index
    %c0_0 = arith.constant 0 : index
    %0 = vector.load %arg1[%c0, %c0_0] : memref<24x32xf32, #tpu.memory_space<vmem>>, vector<24x32xf32>
    %c0_1 = arith.constant 0 : index
    %c0_2 = arith.constant 0 : index
    %1 = vector.load %arg2[%c0_1, %c0_2] : memref<1x32xf32, #tpu.memory_space<vmem>>, vector<1x32xf32>
    %c0_3 = arith.constant 0 : index
    %c0_4 = arith.constant 0 : index
    %2 = vector.load %arg3[%c0_3, %c0_4] : memref<1x32xf32, #tpu.memory_space<vmem>>, vector<1x32xf32>
    %c0_5 = arith.constant 0 : index
    %c0_6 = arith.constant 0 : index
    %3 = tpu.strided_load %arg0[%c0_5, %c0_6] {strides = array<i32: 2, 1>} : memref<256x8xf32, #tpu.memory_space<vmem>>, vector<63x8xf32>
    %c0_7 = arith.constant 0 : index
    %c0_8 = arith.constant 0 : index
    %4 = vector.load %arg19[%c0_7, %c0_8] : memref<126x24xf32, #tpu.memory_space<vmem>>, vector<63x8xf32>
    tpu.vector_store %arg19[%c0_7, %c0_8], %3 {strides = array<i32>} : memref<126x24xf32, #tpu.memory_space<vmem>>, vector<63x8xf32>,
    %c1 = arith.constant 1 : index
    %c0_9 = arith.constant 0 : index
    %5 = tpu.strided_load %arg0[%c1, %c0_9] {strides = array<i32: 2, 1>} : memref<256x8xf32, #tpu.memory_space<vmem>>, vector<63x8xf32>
    %c0_10 = arith.constant 0 : index
    %c8 = arith.constant 8 : index
    %6 = vector.load %arg19[%c0_10, %c8] : memref<126x24xf32, #tpu.memory_space<vmem>>, vector<63x8xf32>
    tpu.vector_store %arg19[%c0_10, %c8], %5 {strides = array<i32>} : memref<126x24xf32, #tpu.memory_space<vmem>>, vector<63x8xf32>,
    %c2 = arith.constant 2 : index
    %c0_11 = arith.constant 0 : index
    %7 = tpu.strided_load %arg0[%c2, %c0_11] {strides = array<i32: 2, 1>} : memref<256x8xf32, #tpu.memory_space<vmem>>, vector<63x8xf32>
    %c0_12 = arith.constant 0 : index
    %c16 = arith.constant 16 : index
    %8 = vector.load %arg19[%c0_12, %c16] : memref<126x24xf32, #tpu.memory_space<vmem>>, vector<63x8xf32>
    tpu.vector_store %arg19[%c0_12, %c16], %7 {strides = array<i32>} : memref<126x24xf32, #tpu.memory_space<vmem>>, vector<63x8xf32>,
    %c128 = arith.constant 128 : index
    %c0_13 = arith.constant 0 : index
    %9 = tpu.strided_load %arg0[%c128, %c0_13] {strides = array<i32: 2, 1>} : memref<256x8xf32, #tpu.memory_space<vmem>>, vector<63x8xf32>
    %c63 = arith.constant 63 : index
    %c0_14 = arith.constant 0 : index
    %10 = vector.load %arg19[%c63, %c0_14] : memref<126x24xf32, #tpu.memory_space<vmem>>, vector<63x8xf32>
    tpu.vector_store %arg19[%c63, %c0_14], %9 {strides = array<i32>} : memref<126x24xf32, #tpu.memory_space<vmem>>, vector<63x8xf32>,
    %c129 = arith.constant 129 : index
    %c0_15 = arith.constant 0 : index
    %11 = tpu.strided_load %arg0[%c129, %c0_15] {strides = array<i32: 2, 1>} : memref<256x8xf32, #tpu.memory_space<vmem>>, vector<63x8xf32>
    %c63_16 = arith.constant 63 : index
    %c8_17 = arith.constant 8 : index
    %12 = vector.load %arg19[%c63_16, %c8_17] : memref<126x24xf32, #tpu.memory_space<vmem>>, vector<63x8xf32>
    tpu.vector_store %arg19[%c63_16, %c8_17], %11 {strides = array<i32>} : memref<126x24xf32, #tpu.memory_space<vmem>>, vector<63x8xf32>,
    %c130 = arith.constant 130 : index
    %c0_18 = arith.constant 0 : index
    %13 = tpu.strided_load %arg0[%c130, %c0_18] {strides = array<i32: 2, 1>} : memref<256x8xf32, #tpu.memory_space<vmem>>, vector<63x8xf32>
    %c63_19 = arith.constant 63 : index
    %c16_20 = arith.constant 16 : index
    %14 = vector.load %arg19[%c63_19, %c16_20] : memref<126x24xf32, #tpu.memory_space<vmem>>, vector<63x8xf32>
    tpu.vector_store %arg19[%c63_19, %c16_20], %13 {strides = array<i32>} : memref<126x24xf32, #tpu.memory_space<vmem>>, vector<63x8xf32>,
    %c0_21 = arith.constant 0 : index
    %c0_22 = arith.constant 0 : index
    %15 = vector.load %arg19[%c0_21, %c0_22] : memref<126x24xf32, #tpu.memory_space<vmem>>, vector<126x24xf32>
    %cst = arith.constant dense<0.000000e+00> : vector<126x32xf32>
    %16 = tpu.matmul %15, %0, %cst {dimension_numbers = #tpu.dot_dimension_numbers<[1], [0], [0], [1], [0, 0, 1, 1], [], []>} : vector<126x24xf32>, vector<24x32xf32>, vector<126x32xf32> -> vector<126x32xf32>
    %cst_23 = arith.constant dense<0.000000e+00> : vector<32xf32>
    %17 = vector.multi_reduction <add>, %16, %cst_23 [0] : vector<126x32xf32> to vector<32xf32>
    %18 = vector.shape_cast %17 : vector<32xf32> to vector<1x32xf32>
    %19 = arith.mulf %16, %16 : vector<126x32xf32>
    %cst_24 = arith.constant dense<0.000000e+00> : vector<32xf32>
    %20 = vector.multi_reduction <add>, %19, %cst_24 [0] : vector<126x32xf32> to vector<32xf32>
    %21 = vector.shape_cast %20 : vector<32xf32> to vector<1x32xf32>
    %cst_25 = arith.constant 0.00793650839 : f32
    %22 = vector.broadcast %cst_25 : f32 to vector<1x32xf32>
    %23 = arith.mulf %18, %22 : vector<1x32xf32>
    %cst_26 = arith.constant 0.00793650839 : f32
    %24 = vector.broadcast %cst_26 : f32 to vector<1x32xf32>
    %25 = arith.mulf %21, %24 : vector<1x32xf32>
    %26 = arith.mulf %23, %23 : vector<1x32xf32>
    %27 = arith.subf %25, %26 : vector<1x32xf32>
    %cst_27 = arith.constant 0.000000e+00 : f32
    %28 = vector.broadcast %cst_27 : f32 to vector<1x32xf32>
    %29 = arith.maximumf %27, %28 : vector<1x32xf32>
    %cst_28 = arith.constant 9.99999974E-6 : f32
    %30 = vector.broadcast %cst_28 : f32 to vector<1x32xf32>
    %31 = arith.addf %29, %30 : vector<1x32xf32>
    %32 = math.rsqrt %31 : vector<1x32xf32>
    %33 = arith.mulf %32, %1 : vector<1x32xf32>
    %34 = arith.mulf %23, %33 : vector<1x32xf32>
    %35 = arith.subf %2, %34 : vector<1x32xf32>
    %36 = vector.broadcast %33 : vector<1x32xf32> to vector<126x32xf32>
    %37 = arith.mulf %16, %36 : vector<126x32xf32>
    %38 = vector.broadcast %35 : vector<1x32xf32> to vector<126x32xf32>
    %39 = arith.addf %37, %38 : vector<126x32xf32>
    %cst_29 = arith.constant 0.00999999977 : f32
    %40 = vector.broadcast %cst_29 : f32 to vector<126x32xf32>
    %41 = arith.mulf %40, %39 : vector<126x32xf32>
    %42 = arith.maximumf %39, %41 : vector<126x32xf32>
    %c0_30 = arith.constant 0 : index
    %c0_31 = arith.constant 0 : index
    %43 = vector.load %arg20[%c0_30, %c0_31] : memref<126x32xf32, #tpu.memory_space<vmem>>, vector<126x32xf32>
    tpu.vector_store %arg20[%c0_30, %c0_31], %42 {strides = array<i32>} : memref<126x32xf32, #tpu.memory_space<vmem>>, vector<126x32xf32>,
    %c0_32 = arith.constant 0 : index
    %c0_33 = arith.constant 0 : index
    %44 = vector.load %arg4[%c0_32, %c0_33] : memref<96x32xf32, #tpu.memory_space<vmem>>, vector<96x32xf32>
    %c0_34 = arith.constant 0 : index
    %c0_35 = arith.constant 0 : index
    %45 = vector.load %arg5[%c0_34, %c0_35] : memref<1x32xf32, #tpu.memory_space<vmem>>, vector<1x32xf32>
    %c0_36 = arith.constant 0 : index
    %c0_37 = arith.constant 0 : index
    %46 = vector.load %arg6[%c0_36, %c0_37] : memref<1x32xf32, #tpu.memory_space<vmem>>, vector<1x32xf32>
    %c0_38 = arith.constant 0 : index
    %c0_39 = arith.constant 0 : index
    %47 = tpu.strided_load %arg20[%c0_38, %c0_39] {strides = array<i32: 2, 1>} : memref<126x32xf32, #tpu.memory_space<vmem>>, vector<31x32xf32>
    %c0_40 = arith.constant 0 : index
    %c0_41 = arith.constant 0 : index
    %48 = vector.load %arg21[%c0_40, %c0_41] : memref<62x96xf32, #tpu.memory_space<vmem>>, vector<31x32xf32>
    tpu.vector_store %arg21[%c0_40, %c0_41], %47 {strides = array<i32>} : memref<62x96xf32, #tpu.memory_space<vmem>>, vector<31x32xf32>,
    %c1_42 = arith.constant 1 : index
    %c0_43 = arith.constant 0 : index
    %49 = tpu.strided_load %arg20[%c1_42, %c0_43] {strides = array<i32: 2, 1>} : memref<126x32xf32, #tpu.memory_space<vmem>>, vector<31x32xf32>
    %c0_44 = arith.constant 0 : index
    %c32 = arith.constant 32 : index
    %50 = vector.load %arg21[%c0_44, %c32] : memref<62x96xf32, #tpu.memory_space<vmem>>, vector<31x32xf32>
    tpu.vector_store %arg21[%c0_44, %c32], %49 {strides = array<i32>} : memref<62x96xf32, #tpu.memory_space<vmem>>, vector<31x32xf32>,
    %c2_45 = arith.constant 2 : index
    %c0_46 = arith.constant 0 : index
    %51 = tpu.strided_load %arg20[%c2_45, %c0_46] {strides = array<i32: 2, 1>} : memref<126x32xf32, #tpu.memory_space<vmem>>, vector<31x32xf32>
    %c0_47 = arith.constant 0 : index
    %c64 = arith.constant 64 : index
    %52 = vector.load %arg21[%c0_47, %c64] : memref<62x96xf32, #tpu.memory_space<vmem>>, vector<31x32xf32>
    tpu.vector_store %arg21[%c0_47, %c64], %51 {strides = array<i32>} : memref<62x96xf32, #tpu.memory_space<vmem>>, vector<31x32xf32>,
    %c63_48 = arith.constant 63 : index
    %c0_49 = arith.constant 0 : index
    %53 = tpu.strided_load %arg20[%c63_48, %c0_49] {strides = array<i32: 2, 1>} : memref<126x32xf32, #tpu.memory_space<vmem>>, vector<31x32xf32>
    %c31 = arith.constant 31 : index
    %c0_50 = arith.constant 0 : index
    %54 = vector.load %arg21[%c31, %c0_50] : memref<62x96xf32, #tpu.memory_space<vmem>>, vector<31x32xf32>
    tpu.vector_store %arg21[%c31, %c0_50], %53 {strides = array<i32>} : memref<62x96xf32, #tpu.memory_space<vmem>>, vector<31x32xf32>,
    %c64_51 = arith.constant 64 : index
    %c0_52 = arith.constant 0 : index
    %55 = tpu.strided_load %arg20[%c64_51, %c0_52] {strides = array<i32: 2, 1>} : memref<126x32xf32, #tpu.memory_space<vmem>>, vector<31x32xf32>
    %c31_53 = arith.constant 31 : index
    %c32_54 = arith.constant 32 : index
    %56 = vector.load %arg21[%c31_53, %c32_54] : memref<62x96xf32, #tpu.memory_space<vmem>>, vector<31x32xf32>
    tpu.vector_store %arg21[%c31_53, %c32_54], %55 {strides = array<i32>} : memref<62x96xf32, #tpu.memory_space<vmem>>, vector<31x32xf32>,
    %c65 = arith.constant 65 : index
    %c0_55 = arith.constant 0 : index
    %57 = tpu.strided_load %arg20[%c65, %c0_55] {strides = array<i32: 2, 1>} : memref<126x32xf32, #tpu.memory_space<vmem>>, vector<31x32xf32>
    %c31_56 = arith.constant 31 : index
    %c64_57 = arith.constant 64 : index
    %58 = vector.load %arg21[%c31_56, %c64_57] : memref<62x96xf32, #tpu.memory_space<vmem>>, vector<31x32xf32>
    tpu.vector_store %arg21[%c31_56, %c64_57], %57 {strides = array<i32>} : memref<62x96xf32, #tpu.memory_space<vmem>>, vector<31x32xf32>,
    %c0_58 = arith.constant 0 : index
    %c0_59 = arith.constant 0 : index
    %59 = vector.load %arg21[%c0_58, %c0_59] : memref<62x96xf32, #tpu.memory_space<vmem>>, vector<62x96xf32>
    %cst_60 = arith.constant dense<0.000000e+00> : vector<62x32xf32>
    %60 = tpu.matmul %59, %44, %cst_60 {dimension_numbers = #tpu.dot_dimension_numbers<[1], [0], [0], [1], [0, 0, 1, 1], [], []>} : vector<62x96xf32>, vector<96x32xf32>, vector<62x32xf32> -> vector<62x32xf32>
    %cst_61 = arith.constant dense<0.000000e+00> : vector<32xf32>
    %61 = vector.multi_reduction <add>, %60, %cst_61 [0] : vector<62x32xf32> to vector<32xf32>
    %62 = vector.shape_cast %61 : vector<32xf32> to vector<1x32xf32>
    %63 = arith.mulf %60, %60 : vector<62x32xf32>
    %cst_62 = arith.constant dense<0.000000e+00> : vector<32xf32>
    %64 = vector.multi_reduction <add>, %63, %cst_62 [0] : vector<62x32xf32> to vector<32xf32>
    %65 = vector.shape_cast %64 : vector<32xf32> to vector<1x32xf32>
    %cst_63 = arith.constant 0.0161290318 : f32
    %66 = vector.broadcast %cst_63 : f32 to vector<1x32xf32>
    %67 = arith.mulf %62, %66 : vector<1x32xf32>
    %cst_64 = arith.constant 0.0161290318 : f32
    %68 = vector.broadcast %cst_64 : f32 to vector<1x32xf32>
    %69 = arith.mulf %65, %68 : vector<1x32xf32>
    %70 = arith.mulf %67, %67 : vector<1x32xf32>
    %71 = arith.subf %69, %70 : vector<1x32xf32>
    %cst_65 = arith.constant 0.000000e+00 : f32
    %72 = vector.broadcast %cst_65 : f32 to vector<1x32xf32>
    %73 = arith.maximumf %71, %72 : vector<1x32xf32>
    %cst_66 = arith.constant 9.99999974E-6 : f32
    %74 = vector.broadcast %cst_66 : f32 to vector<1x32xf32>
    %75 = arith.addf %73, %74 : vector<1x32xf32>
    %76 = math.rsqrt %75 : vector<1x32xf32>
    %77 = arith.mulf %76, %45 : vector<1x32xf32>
    %78 = arith.mulf %67, %77 : vector<1x32xf32>
    %79 = arith.subf %46, %78 : vector<1x32xf32>
    %80 = vector.broadcast %77 : vector<1x32xf32> to vector<62x32xf32>
    %81 = arith.mulf %60, %80 : vector<62x32xf32>
    %82 = vector.broadcast %79 : vector<1x32xf32> to vector<62x32xf32>
    %83 = arith.addf %81, %82 : vector<62x32xf32>
    %cst_67 = arith.constant 0.00999999977 : f32
    %84 = vector.broadcast %cst_67 : f32 to vector<62x32xf32>
    %85 = arith.mulf %84, %83 : vector<62x32xf32>
    %86 = arith.maximumf %83, %85 : vector<62x32xf32>
    %c0_68 = arith.constant 0 : index
    %c0_69 = arith.constant 0 : index
    %87 = vector.load %arg22[%c0_68, %c0_69] : memref<62x32xf32, #tpu.memory_space<vmem>>, vector<62x32xf32>
    tpu.vector_store %arg22[%c0_68, %c0_69], %86 {strides = array<i32>} : memref<62x32xf32, #tpu.memory_space<vmem>>, vector<62x32xf32>,
    %c0_70 = arith.constant 0 : index
    %c0_71 = arith.constant 0 : index
    %88 = vector.load %arg7[%c0_70, %c0_71] : memref<96x32xf32, #tpu.memory_space<vmem>>, vector<96x32xf32>
    %c0_72 = arith.constant 0 : index
    %c0_73 = arith.constant 0 : index
    %89 = vector.load %arg8[%c0_72, %c0_73] : memref<1x32xf32, #tpu.memory_space<vmem>>, vector<1x32xf32>
    %c0_74 = arith.constant 0 : index
    %c0_75 = arith.constant 0 : index
    %90 = vector.load %arg9[%c0_74, %c0_75] : memref<1x32xf32, #tpu.memory_space<vmem>>, vector<1x32xf32>
    %c0_76 = arith.constant 0 : index
    %c0_77 = arith.constant 0 : index
    %91 = tpu.strided_load %arg22[%c0_76, %c0_77] {strides = array<i32: 2, 1>} : memref<62x32xf32, #tpu.memory_space<vmem>>, vector<15x32xf32>
    %c0_78 = arith.constant 0 : index
    %c0_79 = arith.constant 0 : index
    %92 = vector.load %arg23[%c0_78, %c0_79] : memref<30x96xf32, #tpu.memory_space<vmem>>, vector<15x32xf32>
    tpu.vector_store %arg23[%c0_78, %c0_79], %91 {strides = array<i32>} : memref<30x96xf32, #tpu.memory_space<vmem>>, vector<15x32xf32>,
    %c1_80 = arith.constant 1 : index
    %c0_81 = arith.constant 0 : index
    %93 = tpu.strided_load %arg22[%c1_80, %c0_81] {strides = array<i32: 2, 1>} : memref<62x32xf32, #tpu.memory_space<vmem>>, vector<15x32xf32>
    %c0_82 = arith.constant 0 : index
    %c32_83 = arith.constant 32 : index
    %94 = vector.load %arg23[%c0_82, %c32_83] : memref<30x96xf32, #tpu.memory_space<vmem>>, vector<15x32xf32>
    tpu.vector_store %arg23[%c0_82, %c32_83], %93 {strides = array<i32>} : memref<30x96xf32, #tpu.memory_space<vmem>>, vector<15x32xf32>,
    %c2_84 = arith.constant 2 : index
    %c0_85 = arith.constant 0 : index
    %95 = tpu.strided_load %arg22[%c2_84, %c0_85] {strides = array<i32: 2, 1>} : memref<62x32xf32, #tpu.memory_space<vmem>>, vector<15x32xf32>
    %c0_86 = arith.constant 0 : index
    %c64_87 = arith.constant 64 : index
    %96 = vector.load %arg23[%c0_86, %c64_87] : memref<30x96xf32, #tpu.memory_space<vmem>>, vector<15x32xf32>
    tpu.vector_store %arg23[%c0_86, %c64_87], %95 {strides = array<i32>} : memref<30x96xf32, #tpu.memory_space<vmem>>, vector<15x32xf32>,
    %c31_88 = arith.constant 31 : index
    %c0_89 = arith.constant 0 : index
    %97 = tpu.strided_load %arg22[%c31_88, %c0_89] {strides = array<i32: 2, 1>} : memref<62x32xf32, #tpu.memory_space<vmem>>, vector<15x32xf32>
    %c15 = arith.constant 15 : index
    %c0_90 = arith.constant 0 : index
    %98 = vector.load %arg23[%c15, %c0_90] : memref<30x96xf32, #tpu.memory_space<vmem>>, vector<15x32xf32>
    tpu.vector_store %arg23[%c15, %c0_90], %97 {strides = array<i32>} : memref<30x96xf32, #tpu.memory_space<vmem>>, vector<15x32xf32>,
    %c32_91 = arith.constant 32 : index
    %c0_92 = arith.constant 0 : index
    %99 = tpu.strided_load %arg22[%c32_91, %c0_92] {strides = array<i32: 2, 1>} : memref<62x32xf32, #tpu.memory_space<vmem>>, vector<15x32xf32>
    %c15_93 = arith.constant 15 : index
    %c32_94 = arith.constant 32 : index
    %100 = vector.load %arg23[%c15_93, %c32_94] : memref<30x96xf32, #tpu.memory_space<vmem>>, vector<15x32xf32>
    tpu.vector_store %arg23[%c15_93, %c32_94], %99 {strides = array<i32>} : memref<30x96xf32, #tpu.memory_space<vmem>>, vector<15x32xf32>,
    %c33 = arith.constant 33 : index
    %c0_95 = arith.constant 0 : index
    %101 = tpu.strided_load %arg22[%c33, %c0_95] {strides = array<i32: 2, 1>} : memref<62x32xf32, #tpu.memory_space<vmem>>, vector<15x32xf32>
    %c15_96 = arith.constant 15 : index
    %c64_97 = arith.constant 64 : index
    %102 = vector.load %arg23[%c15_96, %c64_97] : memref<30x96xf32, #tpu.memory_space<vmem>>, vector<15x32xf32>
    tpu.vector_store %arg23[%c15_96, %c64_97], %101 {strides = array<i32>} : memref<30x96xf32, #tpu.memory_space<vmem>>, vector<15x32xf32>,
    %c0_98 = arith.constant 0 : index
    %c0_99 = arith.constant 0 : index
    %103 = vector.load %arg23[%c0_98, %c0_99] : memref<30x96xf32, #tpu.memory_space<vmem>>, vector<30x96xf32>
    %cst_100 = arith.constant dense<0.000000e+00> : vector<30x32xf32>
    %104 = tpu.matmul %103, %88, %cst_100 {dimension_numbers = #tpu.dot_dimension_numbers<[1], [0], [0], [1], [0, 0, 1, 1], [], []>} : vector<30x96xf32>, vector<96x32xf32>, vector<30x32xf32> -> vector<30x32xf32>
    %cst_101 = arith.constant dense<0.000000e+00> : vector<32xf32>
    %105 = vector.multi_reduction <add>, %104, %cst_101 [0] : vector<30x32xf32> to vector<32xf32>
    %106 = vector.shape_cast %105 : vector<32xf32> to vector<1x32xf32>
    %107 = arith.mulf %104, %104 : vector<30x32xf32>
    %cst_102 = arith.constant dense<0.000000e+00> : vector<32xf32>
    %108 = vector.multi_reduction <add>, %107, %cst_102 [0] : vector<30x32xf32> to vector<32xf32>
    %109 = vector.shape_cast %108 : vector<32xf32> to vector<1x32xf32>
    %cst_103 = arith.constant 0.0333333351 : f32
    %110 = vector.broadcast %cst_103 : f32 to vector<1x32xf32>
    %111 = arith.mulf %106, %110 : vector<1x32xf32>
    %cst_104 = arith.constant 0.0333333351 : f32
    %112 = vector.broadcast %cst_104 : f32 to vector<1x32xf32>
    %113 = arith.mulf %109, %112 : vector<1x32xf32>
    %114 = arith.mulf %111, %111 : vector<1x32xf32>
    %115 = arith.subf %113, %114 : vector<1x32xf32>
    %cst_105 = arith.constant 0.000000e+00 : f32
    %116 = vector.broadcast %cst_105 : f32 to vector<1x32xf32>
    %117 = arith.maximumf %115, %116 : vector<1x32xf32>
    %cst_106 = arith.constant 9.99999974E-6 : f32
    %118 = vector.broadcast %cst_106 : f32 to vector<1x32xf32>
    %119 = arith.addf %117, %118 : vector<1x32xf32>
    %120 = math.rsqrt %119 : vector<1x32xf32>
    %121 = arith.mulf %120, %89 : vector<1x32xf32>
    %122 = arith.mulf %111, %121 : vector<1x32xf32>
    %123 = arith.subf %90, %122 : vector<1x32xf32>
    %124 = vector.broadcast %121 : vector<1x32xf32> to vector<30x32xf32>
    %125 = arith.mulf %104, %124 : vector<30x32xf32>
    %126 = vector.broadcast %123 : vector<1x32xf32> to vector<30x32xf32>
    %127 = arith.addf %125, %126 : vector<30x32xf32>
    %cst_107 = arith.constant 0.00999999977 : f32
    %128 = vector.broadcast %cst_107 : f32 to vector<30x32xf32>
    %129 = arith.mulf %128, %127 : vector<30x32xf32>
    %130 = arith.maximumf %127, %129 : vector<30x32xf32>
    %c0_108 = arith.constant 0 : index
    %c0_109 = arith.constant 0 : index
    %131 = vector.load %arg24[%c0_108, %c0_109] : memref<30x32xf32, #tpu.memory_space<vmem>>, vector<30x32xf32>
    tpu.vector_store %arg24[%c0_108, %c0_109], %130 {strides = array<i32>} : memref<30x32xf32, #tpu.memory_space<vmem>>, vector<30x32xf32>,
    %c0_110 = arith.constant 0 : index
    %c0_111 = arith.constant 0 : index
    %132 = vector.load %arg10[%c0_110, %c0_111] : memref<96x32xf32, #tpu.memory_space<vmem>>, vector<96x32xf32>
    %c0_112 = arith.constant 0 : index
    %c0_113 = arith.constant 0 : index
    %133 = vector.load %arg11[%c0_112, %c0_113] : memref<1x32xf32, #tpu.memory_space<vmem>>, vector<1x32xf32>
    %c0_114 = arith.constant 0 : index
    %c0_115 = arith.constant 0 : index
    %134 = vector.load %arg12[%c0_114, %c0_115] : memref<1x32xf32, #tpu.memory_space<vmem>>, vector<1x32xf32>
    %c0_116 = arith.constant 0 : index
    %c0_117 = arith.constant 0 : index
    %135 = tpu.strided_load %arg24[%c0_116, %c0_117] {strides = array<i32: 2, 1>} : memref<30x32xf32, #tpu.memory_space<vmem>>, vector<7x32xf32>
    %c0_118 = arith.constant 0 : index
    %c0_119 = arith.constant 0 : index
    %136 = vector.load %arg25[%c0_118, %c0_119] : memref<14x96xf32, #tpu.memory_space<vmem>>, vector<7x32xf32>
    tpu.vector_store %arg25[%c0_118, %c0_119], %135 {strides = array<i32>} : memref<14x96xf32, #tpu.memory_space<vmem>>, vector<7x32xf32>,
    %c1_120 = arith.constant 1 : index
    %c0_121 = arith.constant 0 : index
    %137 = tpu.strided_load %arg24[%c1_120, %c0_121] {strides = array<i32: 2, 1>} : memref<30x32xf32, #tpu.memory_space<vmem>>, vector<7x32xf32>
    %c0_122 = arith.constant 0 : index
    %c32_123 = arith.constant 32 : index
    %138 = vector.load %arg25[%c0_122, %c32_123] : memref<14x96xf32, #tpu.memory_space<vmem>>, vector<7x32xf32>
    tpu.vector_store %arg25[%c0_122, %c32_123], %137 {strides = array<i32>} : memref<14x96xf32, #tpu.memory_space<vmem>>, vector<7x32xf32>,
    %c2_124 = arith.constant 2 : index
    %c0_125 = arith.constant 0 : index
    %139 = tpu.strided_load %arg24[%c2_124, %c0_125] {strides = array<i32: 2, 1>} : memref<30x32xf32, #tpu.memory_space<vmem>>, vector<7x32xf32>
    %c0_126 = arith.constant 0 : index
    %c64_127 = arith.constant 64 : index
    %140 = vector.load %arg25[%c0_126, %c64_127] : memref<14x96xf32, #tpu.memory_space<vmem>>, vector<7x32xf32>
    tpu.vector_store %arg25[%c0_126, %c64_127], %139 {strides = array<i32>} : memref<14x96xf32, #tpu.memory_space<vmem>>, vector<7x32xf32>,
    %c15_128 = arith.constant 15 : index
    %c0_129 = arith.constant 0 : index
    %141 = tpu.strided_load %arg24[%c15_128, %c0_129] {strides = array<i32: 2, 1>} : memref<30x32xf32, #tpu.memory_space<vmem>>, vector<7x32xf32>
    %c7 = arith.constant 7 : index
    %c0_130 = arith.constant 0 : index
    %142 = vector.load %arg25[%c7, %c0_130] : memref<14x96xf32, #tpu.memory_space<vmem>>, vector<7x32xf32>
    tpu.vector_store %arg25[%c7, %c0_130], %141 {strides = array<i32>} : memref<14x96xf32, #tpu.memory_space<vmem>>, vector<7x32xf32>,
    %c16_131 = arith.constant 16 : index
    %c0_132 = arith.constant 0 : index
    %143 = tpu.strided_load %arg24[%c16_131, %c0_132] {strides = array<i32: 2, 1>} : memref<30x32xf32, #tpu.memory_space<vmem>>, vector<7x32xf32>
    %c7_133 = arith.constant 7 : index
    %c32_134 = arith.constant 32 : index
    %144 = vector.load %arg25[%c7_133, %c32_134] : memref<14x96xf32, #tpu.memory_space<vmem>>, vector<7x32xf32>
    tpu.vector_store %arg25[%c7_133, %c32_134], %143 {strides = array<i32>} : memref<14x96xf32, #tpu.memory_space<vmem>>, vector<7x32xf32>,
    %c17 = arith.constant 17 : index
    %c0_135 = arith.constant 0 : index
    %145 = tpu.strided_load %arg24[%c17, %c0_135] {strides = array<i32: 2, 1>} : memref<30x32xf32, #tpu.memory_space<vmem>>, vector<7x32xf32>
    %c7_136 = arith.constant 7 : index
    %c64_137 = arith.constant 64 : index
    %146 = vector.load %arg25[%c7_136, %c64_137] : memref<14x96xf32, #tpu.memory_space<vmem>>, vector<7x32xf32>
    tpu.vector_store %arg25[%c7_136, %c64_137], %145 {strides = array<i32>} : memref<14x96xf32, #tpu.memory_space<vmem>>, vector<7x32xf32>,
    %c0_138 = arith.constant 0 : index
    %c0_139 = arith.constant 0 : index
    %147 = vector.load %arg25[%c0_138, %c0_139] : memref<14x96xf32, #tpu.memory_space<vmem>>, vector<14x96xf32>
    %cst_140 = arith.constant dense<0.000000e+00> : vector<14x32xf32>
    %148 = tpu.matmul %147, %132, %cst_140 {dimension_numbers = #tpu.dot_dimension_numbers<[1], [0], [0], [1], [0, 0, 1, 1], [], []>} : vector<14x96xf32>, vector<96x32xf32>, vector<14x32xf32> -> vector<14x32xf32>
    %cst_141 = arith.constant dense<0.000000e+00> : vector<32xf32>
    %149 = vector.multi_reduction <add>, %148, %cst_141 [0] : vector<14x32xf32> to vector<32xf32>
    %150 = vector.shape_cast %149 : vector<32xf32> to vector<1x32xf32>
    %151 = arith.mulf %148, %148 : vector<14x32xf32>
    %cst_142 = arith.constant dense<0.000000e+00> : vector<32xf32>
    %152 = vector.multi_reduction <add>, %151, %cst_142 [0] : vector<14x32xf32> to vector<32xf32>
    %153 = vector.shape_cast %152 : vector<32xf32> to vector<1x32xf32>
    %cst_143 = arith.constant 0.0714285746 : f32
    %154 = vector.broadcast %cst_143 : f32 to vector<1x32xf32>
    %155 = arith.mulf %150, %154 : vector<1x32xf32>
    %cst_144 = arith.constant 0.0714285746 : f32
    %156 = vector.broadcast %cst_144 : f32 to vector<1x32xf32>
    %157 = arith.mulf %153, %156 : vector<1x32xf32>
    %158 = arith.mulf %155, %155 : vector<1x32xf32>
    %159 = arith.subf %157, %158 : vector<1x32xf32>
    %cst_145 = arith.constant 0.000000e+00 : f32
    %160 = vector.broadcast %cst_145 : f32 to vector<1x32xf32>
    %161 = arith.maximumf %159, %160 : vector<1x32xf32>
    %cst_146 = arith.constant 9.99999974E-6 : f32
    %162 = vector.broadcast %cst_146 : f32 to vector<1x32xf32>
    %163 = arith.addf %161, %162 : vector<1x32xf32>
    %164 = math.rsqrt %163 : vector<1x32xf32>
    %165 = arith.mulf %164, %133 : vector<1x32xf32>
    %166 = arith.mulf %155, %165 : vector<1x32xf32>
    %167 = arith.subf %134, %166 : vector<1x32xf32>
    %168 = vector.broadcast %165 : vector<1x32xf32> to vector<14x32xf32>
    %169 = arith.mulf %148, %168 : vector<14x32xf32>
    %170 = vector.broadcast %167 : vector<1x32xf32> to vector<14x32xf32>
    %171 = arith.addf %169, %170 : vector<14x32xf32>
    %cst_147 = arith.constant 0.00999999977 : f32
    %172 = vector.broadcast %cst_147 : f32 to vector<14x32xf32>
    %173 = arith.mulf %172, %171 : vector<14x32xf32>
    %174 = arith.maximumf %171, %173 : vector<14x32xf32>
    %c0_148 = arith.constant 0 : index
    %c0_149 = arith.constant 0 : index
    %175 = vector.load %arg26[%c0_148, %c0_149] : memref<14x32xf32, #tpu.memory_space<vmem>>, vector<14x32xf32>
    tpu.vector_store %arg26[%c0_148, %c0_149], %174 {strides = array<i32>} : memref<14x32xf32, #tpu.memory_space<vmem>>, vector<14x32xf32>,
    %c0_150 = arith.constant 0 : index
    %c0_151 = arith.constant 0 : index
    %176 = vector.load %arg13[%c0_150, %c0_151] : memref<128x32xf32, #tpu.memory_space<vmem>>, vector<128x32xf32>
    %c0_152 = arith.constant 0 : index
    %c0_153 = arith.constant 0 : index
    %177 = vector.load %arg14[%c0_152, %c0_153] : memref<1x32xf32, #tpu.memory_space<vmem>>, vector<1x32xf32>
    %c0_154 = arith.constant 0 : index
    %c0_155 = arith.constant 0 : index
    %178 = vector.load %arg15[%c0_154, %c0_155] : memref<1x32xf32, #tpu.memory_space<vmem>>, vector<1x32xf32>
    %c0_156 = arith.constant 0 : index
    %c0_157 = arith.constant 0 : index
    %179 = vector.load %arg26[%c0_156, %c0_157] : memref<14x32xf32, #tpu.memory_space<vmem>>, vector<4x32xf32>
    %c0_158 = arith.constant 0 : index
    %c0_159 = arith.constant 0 : index
    %180 = vector.load %arg27[%c0_158, %c0_159] : memref<8x128xf32, #tpu.memory_space<vmem>>, vector<4x32xf32>
    tpu.vector_store %arg27[%c0_158, %c0_159], %179 {strides = array<i32>} : memref<8x128xf32, #tpu.memory_space<vmem>>, vector<4x32xf32>,
    %c1_160 = arith.constant 1 : index
    %c0_161 = arith.constant 0 : index
    %181 = vector.load %arg26[%c1_160, %c0_161] : memref<14x32xf32, #tpu.memory_space<vmem>>, vector<4x32xf32>
    %c0_162 = arith.constant 0 : index
    %c32_163 = arith.constant 32 : index
    %182 = vector.load %arg27[%c0_162, %c32_163] : memref<8x128xf32, #tpu.memory_space<vmem>>, vector<4x32xf32>
    tpu.vector_store %arg27[%c0_162, %c32_163], %181 {strides = array<i32>} : memref<8x128xf32, #tpu.memory_space<vmem>>, vector<4x32xf32>,
    %c2_164 = arith.constant 2 : index
    %c0_165 = arith.constant 0 : index
    %183 = vector.load %arg26[%c2_164, %c0_165] : memref<14x32xf32, #tpu.memory_space<vmem>>, vector<4x32xf32>
    %c0_166 = arith.constant 0 : index
    %c64_167 = arith.constant 64 : index
    %184 = vector.load %arg27[%c0_166, %c64_167] : memref<8x128xf32, #tpu.memory_space<vmem>>, vector<4x32xf32>
    tpu.vector_store %arg27[%c0_166, %c64_167], %183 {strides = array<i32>} : memref<8x128xf32, #tpu.memory_space<vmem>>, vector<4x32xf32>,
    %c3 = arith.constant 3 : index
    %c0_168 = arith.constant 0 : index
    %185 = vector.load %arg26[%c3, %c0_168] : memref<14x32xf32, #tpu.memory_space<vmem>>, vector<4x32xf32>
    %c0_169 = arith.constant 0 : index
    %c96 = arith.constant 96 : index
    %186 = vector.load %arg27[%c0_169, %c96] : memref<8x128xf32, #tpu.memory_space<vmem>>, vector<4x32xf32>
    tpu.vector_store %arg27[%c0_169, %c96], %185 {strides = array<i32>} : memref<8x128xf32, #tpu.memory_space<vmem>>, vector<4x32xf32>,
    %c7_170 = arith.constant 7 : index
    %c0_171 = arith.constant 0 : index
    %187 = vector.load %arg26[%c7_170, %c0_171] : memref<14x32xf32, #tpu.memory_space<vmem>>, vector<4x32xf32>
    %c4 = arith.constant 4 : index
    %c0_172 = arith.constant 0 : index
    %188 = vector.load %arg27[%c4, %c0_172] : memref<8x128xf32, #tpu.memory_space<vmem>>, vector<4x32xf32>
    tpu.vector_store %arg27[%c4, %c0_172], %187 {strides = array<i32>} : memref<8x128xf32, #tpu.memory_space<vmem>>, vector<4x32xf32>,
    %c8_173 = arith.constant 8 : index
    %c0_174 = arith.constant 0 : index
    %189 = vector.load %arg26[%c8_173, %c0_174] : memref<14x32xf32, #tpu.memory_space<vmem>>, vector<4x32xf32>
    %c4_175 = arith.constant 4 : index
    %c32_176 = arith.constant 32 : index
    %190 = vector.load %arg27[%c4_175, %c32_176] : memref<8x128xf32, #tpu.memory_space<vmem>>, vector<4x32xf32>
    tpu.vector_store %arg27[%c4_175, %c32_176], %189 {strides = array<i32>} : memref<8x128xf32, #tpu.memory_space<vmem>>, vector<4x32xf32>,
    %c9 = arith.constant 9 : index
    %c0_177 = arith.constant 0 : index
    %191 = vector.load %arg26[%c9, %c0_177] : memref<14x32xf32, #tpu.memory_space<vmem>>, vector<4x32xf32>
    %c4_178 = arith.constant 4 : index
    %c64_179 = arith.constant 64 : index
    %192 = vector.load %arg27[%c4_178, %c64_179] : memref<8x128xf32, #tpu.memory_space<vmem>>, vector<4x32xf32>
    tpu.vector_store %arg27[%c4_178, %c64_179], %191 {strides = array<i32>} : memref<8x128xf32, #tpu.memory_space<vmem>>, vector<4x32xf32>,
    %c10 = arith.constant 10 : index
    %c0_180 = arith.constant 0 : index
    %193 = vector.load %arg26[%c10, %c0_180] : memref<14x32xf32, #tpu.memory_space<vmem>>, vector<4x32xf32>
    %c4_181 = arith.constant 4 : index
    %c96_182 = arith.constant 96 : index
    %194 = vector.load %arg27[%c4_181, %c96_182] : memref<8x128xf32, #tpu.memory_space<vmem>>, vector<4x32xf32>
    tpu.vector_store %arg27[%c4_181, %c96_182], %193 {strides = array<i32>} : memref<8x128xf32, #tpu.memory_space<vmem>>, vector<4x32xf32>,
    %c0_183 = arith.constant 0 : index
    %c0_184 = arith.constant 0 : index
    %195 = vector.load %arg27[%c0_183, %c0_184] : memref<8x128xf32, #tpu.memory_space<vmem>>, vector<8x128xf32>
    %cst_185 = arith.constant dense<0.000000e+00> : vector<8x32xf32>
    %196 = tpu.matmul %195, %176, %cst_185 {dimension_numbers = #tpu.dot_dimension_numbers<[1], [0], [0], [1], [0, 0, 1, 1], [], []>} : vector<8x128xf32>, vector<128x32xf32>, vector<8x32xf32> -> vector<8x32xf32>
    %cst_186 = arith.constant dense<0.000000e+00> : vector<32xf32>
    %197 = vector.multi_reduction <add>, %196, %cst_186 [0] : vector<8x32xf32> to vector<32xf32>
    %198 = vector.shape_cast %197 : vector<32xf32> to vector<1x32xf32>
    %199 = arith.mulf %196, %196 : vector<8x32xf32>
    %cst_187 = arith.constant dense<0.000000e+00> : vector<32xf32>
    %200 = vector.multi_reduction <add>, %199, %cst_187 [0] : vector<8x32xf32> to vector<32xf32>
    %201 = vector.shape_cast %200 : vector<32xf32> to vector<1x32xf32>
    %cst_188 = arith.constant 1.250000e-01 : f32
    %202 = vector.broadcast %cst_188 : f32 to vector<1x32xf32>
    %203 = arith.mulf %198, %202 : vector<1x32xf32>
    %cst_189 = arith.constant 1.250000e-01 : f32
    %204 = vector.broadcast %cst_189 : f32 to vector<1x32xf32>
    %205 = arith.mulf %201, %204 : vector<1x32xf32>
    %206 = arith.mulf %203, %203 : vector<1x32xf32>
    %207 = arith.subf %205, %206 : vector<1x32xf32>
    %cst_190 = arith.constant 0.000000e+00 : f32
    %208 = vector.broadcast %cst_190 : f32 to vector<1x32xf32>
    %209 = arith.maximumf %207, %208 : vector<1x32xf32>
    %cst_191 = arith.constant 9.99999974E-6 : f32
    %210 = vector.broadcast %cst_191 : f32 to vector<1x32xf32>
    %211 = arith.addf %209, %210 : vector<1x32xf32>
    %212 = math.rsqrt %211 : vector<1x32xf32>
    %213 = arith.mulf %212, %177 : vector<1x32xf32>
    %214 = arith.mulf %203, %213 : vector<1x32xf32>
    %215 = arith.subf %178, %214 : vector<1x32xf32>
    %216 = vector.broadcast %213 : vector<1x32xf32> to vector<8x32xf32>
    %217 = arith.mulf %196, %216 : vector<8x32xf32>
    %218 = vector.broadcast %215 : vector<1x32xf32> to vector<8x32xf32>
    %219 = arith.addf %217, %218 : vector<8x32xf32>
    %cst_192 = arith.constant 0.00999999977 : f32
    %220 = vector.broadcast %cst_192 : f32 to vector<8x32xf32>
    %221 = arith.mulf %220, %219 : vector<8x32xf32>
    %222 = arith.maximumf %219, %221 : vector<8x32xf32>
    %c0_193 = arith.constant 0 : index
    %c0_194 = arith.constant 0 : index
    %223 = vector.load %arg28[%c0_193, %c0_194] : memref<8x32xf32, #tpu.memory_space<vmem>>, vector<8x32xf32>
    tpu.vector_store %arg28[%c0_193, %c0_194], %222 {strides = array<i32>} : memref<8x32xf32, #tpu.memory_space<vmem>>, vector<8x32xf32>,
    %c0_195 = arith.constant 0 : index
    %c0_196 = arith.constant 0 : index
    %224 = vector.load %arg16[%c0_195, %c0_196] : memref<32x16xf32, #tpu.memory_space<vmem>>, vector<32x16xf32>
    %c0_197 = arith.constant 0 : index
    %c0_198 = arith.constant 0 : index
    %225 = vector.load %arg17[%c0_197, %c0_198] : memref<1x16xf32, #tpu.memory_space<vmem>>, vector<1x16xf32>
    %c0_199 = arith.constant 0 : index
    %c0_200 = arith.constant 0 : index
    %226 = vector.load %arg28[%c0_199, %c0_200] : memref<8x32xf32, #tpu.memory_space<vmem>>, vector<8x32xf32>
    %cst_201 = arith.constant dense<0.000000e+00> : vector<8x16xf32>
    %227 = tpu.matmul %226, %224, %cst_201 {dimension_numbers = #tpu.dot_dimension_numbers<[1], [0], [0], [1], [0, 0, 1, 1], [], []>} : vector<8x32xf32>, vector<32x16xf32>, vector<8x16xf32> -> vector<8x16xf32>
    %228 = vector.broadcast %225 : vector<1x16xf32> to vector<8x16xf32>
    %229 = arith.addf %227, %228 : vector<8x16xf32>
    %c0_202 = arith.constant 0 : index
    %c0_203 = arith.constant 0 : index
    %230 = vector.load %arg18[%c0_202, %c0_203] : memref<8x16xf32, #tpu.memory_space<vmem>>, vector<8x16xf32>
    tpu.vector_store %arg18[%c0_202, %c0_203], %229 {strides = array<i32>} : memref<8x16xf32, #tpu.memory_space<vmem>>, vector<8x16xf32>,
    return
  }
}

</mosaic_0001>

<bundles_post_ra>
// kernel: tpu_custom_call.1
= control target key start
LH: loop header
LB: loop body
LE: loop exit
PB: predicated region body
PF: predicated region fallthrough
CT: control target
= control target key end

     0   :  { %s3258_s0 = inlined_call_operand.vmem [shape: f32[256,8], index: 0, kind: input, shape index: {}]   ;;  %s3259_s1 = inlined_call_operand.vmem [shape: f32[24,32], index: 1, kind: input, shape index: {}]   ;;  %s3260_s2 = inlined_call_operand.vmem [shape: f32[1,32], index: 2, kind: input, shape index: {}]   ;;  %s3261_s3 = inlined_call_operand.vmem [shape: f32[1,32], index: 3, kind: input, shape index: {}]   ;;  %s3262_s4 = inlined_call_operand.vmem [shape: f32[96,32], index: 4, kind: input, shape index: {}]   ;;  %s3263_s5 = inlined_call_operand.vmem [shape: f32[1,32], index: 5, kind: input, shape index: {}]   ;;  %s3264_s6 = inlined_call_operand.vmem [shape: f32[1,32], index: 6, kind: input, shape index: {}]   ;;  %s3265_s7 = inlined_call_operand.vmem [shape: f32[96,32], index: 7, kind: input, shape index: {}]   ;;  %s3266_s8 = inlined_call_operand.vmem [shape: f32[1,32], index: 8, kind: input, shape index: {}]   ;;  %s3267_s9 = inlined_call_operand.vmem [shape: f32[1,32], index: 9, kind: input, shape index: {}]   ;;  %s3268_s10 = inlined_call_operand.vmem [shape: f32[96,32], index: 10, kind: input, shape index: {}]   ;;  %s3269_s11 = inlined_call_operand.vmem [shape: f32[1,32], index: 11, kind: input, shape index: {}]   ;;  %s3270_s12 = inlined_call_operand.vmem [shape: f32[1,32], index: 12, kind: input, shape index: {}]   ;;  %s3271_s13 = inlined_call_operand.vmem [shape: f32[128,32], index: 13, kind: input, shape index: {}]   ;;  %s3272_s14 = inlined_call_operand.vmem [shape: f32[1,32], index: 14, kind: input, shape index: {}]   ;;  %s3273_s15 = inlined_call_operand.vmem [shape: f32[1,32], index: 15, kind: input, shape index: {}]   ;;  %s3274_s16 = inlined_call_operand.vmem [shape: f32[32,16], index: 16, kind: input, shape index: {}]   ;;  %s3275_s17 = inlined_call_operand.vmem [shape: f32[1,16], index: 17, kind: input, shape index: {}]   ;;  %s3276_s18 = inlined_call_operand.hbm [shape: f32[8,16], index: 18, kind: output, shape index: {}]  }
   0x1   :  { %3279 = sst [smem:[#allocation15_spill]] %s3258_s0 }
   0x2   :  { %3280 = sst [smem:[#allocation16_spill]] %s3259_s1 }
   0x3   :  { %3281 = sst [smem:[#allocation17_spill]] %s3260_s2 }
   0x4   :  { %s3282_s29 = sld [smem:[#allocation15_spill]]  ;;  %s2344_s19 = smov 16   ;;  %vm80_vm0 = vcmask 64512   ;;  %vm88_vm1 = vcmask 63488  }
   0x5   :  { %s2345_s1 = smov 8   ;;  %s3283_s25 = sld [smem:[#allocation16_spill]] }
   0xa   :  { %v1867_v0 = vld [vmem:[%s3282_s29 + $0x2] ss:$2 sm:$0xff]  ;;  %v1859_v1 = vld [vmem:[%s3282_s29 + $0x1] ss:$2 sm:$0xff]  ;;  %v1868_v2 = vld [vmem:[%s3282_s29 + $0x12] ss:$2 sm:$0xff] }
   0xb   :  { %172 = vrot.lane.b32.xlu1 %v1867_v0, %s2344_s19  ;;  %114 = vrot.lane.b32.xlu0 %v1859_v1, %s2345_s1  ;;  %v1860_v3 = vld [vmem:[%s3282_s29 + $0x11] ss:$2 sm:$0xff]  ;;  %v1861_v5 = vld [vmem:[%s3282_s29 + $0x21] ss:$2 sm:$0xff] }
   0xc   :  { %v1862_v4 = vld [vmem:[%s3282_s29 + $0x31] ss:$2 sm:$0xff]  ;;  %v1870_v6 = vld [vmem:[%s3282_s29 + $0x32] ss:$2 sm:$0xff]  ;;  %v1869_v7 = vld [vmem:[%s3282_s29 + $0x22] ss:$2 sm:$0xff] }
   0xd   :  { %v65_v8 = vld [vmem:[%s3282_s29] ss:$2 sm:$0xff]  ;;  %v1864_v9 = vld [vmem:[%s3282_s29 + $0x51] ss:$2 sm:$0xff]  ;;  %v1852_v11 = vld [vmem:[%s3282_s29 + $0x10] ss:$2 sm:$0xff] }
   0xe   :  { %81 = vst.msk [vmem:[#allocation2] sm:$0xff] %vm80_vm0, %v65_v8  ;;  %v60_v10 = vld [vmem:[%s3283_s25] sm:$0xff]  ;;  %v1854_v12 = vld [vmem:[%s3282_s29 + $0x30] ss:$2 sm:$0xff]  ;;  %82 = vst.msk [vmem:[#allocation2 + $0x8] sm:$0xff] %vm80_vm0, %v1852_v11 }
   0xf   :  { %174 = vrot.lane.b32.xlu1 %v1868_v2, %s2344_s19  ;;  %116 = vrot.lane.b32.xlu0 %v1860_v3, %s2345_s1  ;;  %v1863_v13 = vld [vmem:[%s3282_s29 + $0x41] ss:$2 sm:$0xff]  ;;  %84 = vst.msk [vmem:[#allocation2 + $0x18] sm:$0xff] %vm80_vm0, %v1854_v12  ;;  %v1853_v14 = vld [vmem:[%s3282_s29 + $0x20] ss:$2 sm:$0xff] }
  0x10   :  { %v61_v15 = vld [vmem:[%s3283_s25 + $0x8] sm:$0xff]  ;;  %83 = vst.msk [vmem:[#allocation2 + $0x10] sm:$0xff] %vm80_vm0, %v1853_v14  ;;  %v1856_v17 = vld [vmem:[%s3282_s29 + $0x50] ss:$2 sm:$0xff] }
  0x11   :  { %v2191_v16 = vpack.c.bf16 %v61_v15, %v60_v10  ;;  %v1855_v18 = vld [vmem:[%s3282_s29 + $0x40] ss:$2 sm:$0xff]  ;;  %86 = vst.msk [vmem:[#allocation2 + $0x28] sm:$0xff] %vm80_vm0, %v1856_v17  ;;  %v1858_v20 = vld [vmem:[%s3282_s29 + $0x70] ss:$2 sm:$0x7f] }
  0x12   :  { %v1857_v19 = vld [vmem:[%s3282_s29 + $0x60] ss:$2 sm:$0xff]  ;;  %85 = vst.msk [vmem:[#allocation2 + $0x20] sm:$0xff] %vm80_vm0, %v1855_v18  ;;  %v62_v22 = vld [vmem:[%s3283_s25 + $0x10] sm:$0xff] }
  0x13   :  { %120 = vrot.lane.b32.xlu1 %v1862_v4, %s2345_s1  ;;  %118 = vrot.lane.b32.xlu0 %v1861_v5, %s2345_s1  ;;  %87 = vst.msk [vmem:[#allocation2 + $0x30] sm:$0xff] %vm80_vm0, %v1857_v19  ;;  %v1875_v21 = vld [vmem:[%s3282_s29 + $0x80] ss:$2 sm:$0xff] }
  0x14   :  { %89 = vst.msk [vmem:[#allocation2 + $0x38] sm:$0x7f] %vm88_vm1, %v1858_v20 }
  0x15   :  { %222 = vst.msk [vmem:[#allocation2 + $0x3f] sm:$0xff] %vm80_vm0, %v1875_v21 }
  0x17   :  { %178 = vrot.lane.b32.xlu1 %v1870_v6, %s2344_s19  ;;  %176 = vrot.lane.b32.xlu0 %v1869_v7, %s2344_s19 }
  0x1b   :  { %124 = vrot.lane.b32.xlu1 %v1864_v9, %s2345_s1  ;;  %122 = vrot.lane.b32.xlu0 %v1863_v13, %s2345_s1 }
  0x1c   :  { %23 = vsyncpa [#allocation13], 0  ;;  %v1872_v23 = vld [vmem:[%s3282_s29 + $0x52] ss:$2 sm:$0xff]  ;;  %v1871_v24 = vld [vmem:[%s3282_s29 + $0x42] ss:$2 sm:$0xff]  ;;  %2192 = vmatprep.subr.bf16.mxu0 %v2191_v16  ;;  %2297 = vmatprep.subr.bf16.mxu1 %v2191_v16 }
  0x1d   :  { %2194 = vmatpush3.bf16.msra.mxu0 %v2191_v16  ;;  %2299 = vmatpush3.bf16.msra.mxu1 %v2191_v16  ;;  %v1877_v25 = vld [vmem:[%s3282_s29 + $0xa0] ss:$2 sm:$0xff]  ;;  %v1865_v26 = vld [vmem:[%s3282_s29 + $0x61] ss:$2 sm:$0xff]  ;;  %v1876_v28 = vld [vmem:[%s3282_s29 + $0x90] ss:$2 sm:$0xff] }
  0x1e   :  { %2026 = vmatprep.subr.mxu0 %v62_v22  ;;  %2298 = vmatprep.subr.mxu1 %v62_v22  ;;  %224 = vst.msk [vmem:[#allocation2 + $0x4f] sm:$0xff] %vm80_vm0, %v1877_v25  ;;  %v1866_v27 = vld [vmem:[%s3282_s29 + $0x71] ss:$2 sm:$0x7f]  ;;  %223 = vst.msk [vmem:[#allocation2 + $0x47] sm:$0xff] %vm80_vm0, %v1876_v28  ;;  %vm138_vm2 = vcmask 130112  }
  0x1f   :  { %182 = vrot.lane.b32.xlu1 %v1872_v23, %s2344_s19  ;;  %180 = vrot.lane.b32.xlu0 %v1871_v24, %s2344_s19  ;;  %v1883_v29 = vld [vmem:[%s3282_s29 + $0x81] ss:$2 sm:$0xff]  ;;  %v1873_v30 = vld [vmem:[%s3282_s29 + $0x62] ss:$2 sm:$0xff]  ;;  %vm196_vm3 = vcmask 195712   ;;  %vm358_vm4 = vcmask 195584  }
  0x20   :  { %v1879_v31 = vld [vmem:[%s3282_s29 + $0xc0] ss:$2 sm:$0xff]  ;;  %v1874_v33 = vld [vmem:[%s3282_s29 + $0x72] ss:$2 sm:$0x7f]  ;;  %vm146_vm5 = vcmask 129088  }
  0x21   :  { %2027 = vmatpush3.msra.mxu0 %v62_v22  ;;  %2300 = vmatpush3.msra.mxu1 %v62_v22  ;;  %v1891_v32 = vld [vmem:[%s3282_s29 + $0x82] ss:$2 sm:$0xff]  ;;  %226 = vst.msk [vmem:[#allocation2 + $0x5f] sm:$0xff] %vm80_vm0, %v1879_v31  ;;  %v1885_v35 = vld [vmem:[%s3282_s29 + $0xa1] ss:$2 sm:$0xff]  ;;  %vm204_vm6 = vcmask 194688  }
  0x22   :  { %v1878_v34 = vld [vmem:[%s3282_s29 + $0xb0] ss:$2 sm:$0xff]  ;;  %v1884_v36 = vld [vmem:[%s3282_s29 + $0x91] ss:$2 sm:$0xff]  ;;  %v1881_v37 = vld [vmem:[%s3282_s29 + $0xe0] ss:$2 sm:$0xff] }
  0x23   :  { %128 = vrot.lane.b32.xlu1 %v1866_v27, %s2345_s1  ;;  %126 = vrot.lane.b32.xlu0 %v1865_v26, %s2345_s1  ;;  %225 = vst.msk [vmem:[#allocation2 + $0x57] sm:$0xff] %vm80_vm0, %v1878_v34  ;;  %v1893_v38 = vld [vmem:[%s3282_s29 + $0xa2] ss:$2 sm:$0xff]  ;;  %v1892_v39 = vld [vmem:[%s3282_s29 + $0x92] ss:$2 sm:$0xff]  ;;  %228 = vst.msk [vmem:[#allocation2 + $0x6f] sm:$0xff] %vm80_vm0, %v1881_v37 }
  0x24   :  { %v1880_v40 = vld [vmem:[%s3282_s29 + $0xd0] ss:$2 sm:$0xff]  ;;  %v1887_v41 = vld [vmem:[%s3282_s29 + $0xc1] ss:$2 sm:$0xff]  ;;  %v1886_v42 = vld [vmem:[%s3282_s29 + $0xb1] ss:$2 sm:$0xff] }
  0x25   :  { %227 = vst.msk [vmem:[#allocation2 + $0x67] sm:$0xff] %vm80_vm0, %v1880_v40  ;;  %v1882_v43 = vld [vmem:[%s3282_s29 + $0xf0] ss:$2 sm:$0x7f]  ;;  %v1889_v46 = vld [vmem:[%s3282_s29 + $0xe1] ss:$2 sm:$0xff] }
  0x26   :  { %v1895_v44 = vld [vmem:[%s3282_s29 + $0xc2] ss:$2 sm:$0xff]  ;;  %v1894_v45 = vld [vmem:[%s3282_s29 + $0xb2] ss:$2 sm:$0xff]  ;;  %229 = vst.msk [vmem:[#allocation2 + $0x77] sm:$0x7f] %vm88_vm1, %v1882_v43 }
  0x27   :  { %254 = vrot.lane.b32.xlu1 %v1883_v29, %s2345_s1  ;;  %184 = vrot.lane.b32.xlu0 %v1873_v30, %s2344_s19  ;;  %v1888_v47 = vld [vmem:[%s3282_s29 + $0xd1] ss:$2 sm:$0xff]  ;;  %v1897_v48 = vld [vmem:[%s3282_s29 + $0xe2] ss:$2 sm:$0xff]  ;;  %vm552_vm7 = vcmask 261120   ;;  %vm582_vm8 = vcmask 259072  }
  0x28   :  { %v1896_v49 = vld [vmem:[%s3282_s29 + $0xd2] ss:$2 sm:$0xff]  ;;  %v1890_v50 = vld [vmem:[%s3282_s29 + $0xf1] ss:$2 sm:$0x7f]  ;;  %s3284_s2 = sld [smem:[#allocation17_spill]] }
  0x29   :  { %v1898_v51 = vld [vmem:[%s3282_s29 + $0xf2] ss:$2 sm:$0x7f]  ;;  %s2346_s22 = smov 32   ;;  %vm768_vm9 = vcmask 260096   ;;  %vm794_vm10 = vcmask 523520  }
  0x2a   :  { %vm824_vm11 = vcmask 785920   ;;  %vm798_vm12 = vcmask 522496   ;;  %vm906_vm13 = vcmask 785408   ;;  %vm828_vm14 = vcmask 784896  }
  0x2b   :  { %310 = vrot.lane.b32.xlu1 %v1891_v32, %s2344_s19  ;;  %186 = vrot.lane.b32.xlu0 %v1874_v33, %s2344_s19  ;;  %vm2349_vm15 = vmmov 0   ;;  %vm1597_vm0 = vcmask 257024   ;;  %vm1604_vm1 = vcmask 519424  }
  0x2f   :  { %258 = vrot.lane.b32.xlu1 %v1885_v35, %s2345_s1  ;;  %256 = vrot.lane.b32.xlu0 %v1884_v36, %s2345_s1 }
  0x33   :  { %314 = vrot.lane.b32.xlu1 %v1893_v38, %s2344_s19  ;;  %312 = vrot.lane.b32.xlu0 %v1892_v39, %s2344_s19 }
  0x37   :  { %262 = vrot.lane.b32.xlu1 %v1887_v41, %s2345_s1  ;;  %260 = vrot.lane.b32.xlu0 %v1886_v42, %s2345_s1 }
  0x3b   :  { %318 = vrot.lane.b32.xlu1 %v1895_v44, %s2344_s19  ;;  %316 = vrot.lane.b32.xlu0 %v1894_v45, %s2344_s19 }
  0x3f   :  { %266 = vrot.lane.b32.xlu1 %v1889_v46, %s2345_s1  ;;  %264 = vrot.lane.b32.xlu0 %v1888_v47, %s2345_s1 }
  0x43   :  { %322 = vrot.lane.b32.xlu1 %v1897_v48, %s2344_s19  ;;  %320 = vrot.lane.b32.xlu0 %v1896_v49, %s2344_s19 }
  0x47   :  { %268 = vrot.lane.b32.xlu0 %v1890_v50, %s2345_s1  ;;  %324 = vrot.lane.b32.xlu1 %v1898_v51, %s2344_s19 }
  0x7d   :  { %v173_v52 = vpop.permute.xlu1 %172  ;;  %v115_v53 = vpop.permute.xlu0 %114 }
  0x7e   :  { %139 = vst.msk [vmem:[#allocation2] sm:$0xff] %vm138_vm2, %v115_v53 }
  0x7f   :  { %197 = vst.msk [vmem:[#allocation2] sm:$0xff] %vm196_vm3, %v173_v52 }
  0x81   :  { %v175_v54 = vpop.permute.xlu1 %174  ;;  %v117_v55 = vpop.permute.xlu0 %116 }
  0x82   :  { %140 = vst.msk [vmem:[#allocation2 + $0x8] sm:$0xff] %vm138_vm2, %v117_v55 }
  0x83   :  { %198 = vst.msk [vmem:[#allocation2 + $0x8] sm:$0xff] %vm196_vm3, %v175_v54 }
  0x85   :  { %v121_v56 = vpop.permute.xlu1 %120  ;;  %v119_v57 = vpop.permute.xlu0 %118 }
  0x86   :  { %142 = vst.msk [vmem:[#allocation2 + $0x18] sm:$0xff] %vm138_vm2, %v121_v56  ;;  %141 = vst.msk [vmem:[#allocation2 + $0x10] sm:$0xff] %vm138_vm2, %v119_v57  ;;  %v342_v58 = vld [vmem:[#allocation2] sm:$0xff] }
  0x87   :  { %2028 = vmatprep.mubr.msk.f32.mxu0 %vm358_vm4, %v342_v58 }
  0x89   :  { %v179_v59 = vpop.permute.xlu1 %178  ;;  %v177_v60 = vpop.permute.xlu0 %176 }
  0x8a   :  { %200 = vst.msk [vmem:[#allocation2 + $0x18] sm:$0xff] %vm196_vm3, %v179_v59  ;;  %199 = vst.msk [vmem:[#allocation2 + $0x10] sm:$0xff] %vm196_vm3, %v177_v60  ;;  %v343_v61 = vld [vmem:[#allocation2 + $0x8] sm:$0xff] }
  0x8b   :  { %2029 = vmatmul.mubr.msk.f32.vlgmr.msra.gmra.mrb[0].mxu0 %vm358_vm4, %v343_v61 }
  0x8d   :  { %v125_v62 = vpop.permute.xlu1 %124  ;;  %v123_v63 = vpop.permute.xlu0 %122 }
  0x8e   :  { %144 = vst.msk [vmem:[#allocation2 + $0x28] sm:$0xff] %vm138_vm2, %v125_v62  ;;  %143 = vst.msk [vmem:[#allocation2 + $0x20] sm:$0xff] %vm138_vm2, %v123_v63 }
  0x91   :  { %v183_v0 = vpop.permute.xlu1 %182  ;;  %v181_v1 = vpop.permute.xlu0 %180  ;;  %v344_v2 = vld [vmem:[#allocation2 + $0x10] sm:$0xff]  ;;  %v345_v3 = vld [vmem:[#allocation2 + $0x18] sm:$0xff] }
  0x92   :  { %202 = vst.msk [vmem:[#allocation2 + $0x28] sm:$0xff] %vm196_vm3, %v183_v0  ;;  %201 = vst.msk [vmem:[#allocation2 + $0x20] sm:$0xff] %vm196_vm3, %v181_v1  ;;  %2031 = vmatprep.mubr.msk.f32.mxu0 %vm358_vm4, %v344_v2  ;;  %v744_v2 = vld [vmem:[%s3262_s4] sm:$0xff] }
  0x93   :  { %2032 = vmatmul.mubr.msk.f32.gmra.mrb[2].mxu0 %vm358_vm4, %v345_v3  ;;  %v745_v3 = vld [vmem:[%s3262_s4 + $0x8] sm:$0xff] }
  0x95   :  { %v129_v4 = vpop.permute.xlu1 %128  ;;  %v127_v5 = vpop.permute.xlu0 %126 }
  0x96   :  { %147 = vst.msk [vmem:[#allocation2 + $0x38] sm:$0x7f] %vm146_vm5, %v129_v4  ;;  %v746_v4 = vld [vmem:[%s3262_s4 + $0x10] sm:$0xff] }
  0x97   :  { %145 = vst.msk [vmem:[#allocation2 + $0x30] sm:$0xff] %vm138_vm2, %v127_v5 }
  0x99   :  { %v255_v6 = vpop.permute.xlu1 %254  ;;  %v185_v7 = vpop.permute.xlu0 %184  ;;  %v346_v8 = vld [vmem:[#allocation2 + $0x20] sm:$0xff]  ;;  %v347_v9 = vld [vmem:[#allocation2 + $0x28] sm:$0xff] }
  0x9a   :  { %278 = vst.msk [vmem:[#allocation2 + $0x3f] sm:$0xff] %vm138_vm2, %v255_v6  ;;  %2034 = vmatprep.mubr.msk.f32.mxu0 %vm358_vm4, %v346_v8  ;;  %v747_v8 = vld [vmem:[%s3262_s4 + $0x18] sm:$0xff] }
  0x9b   :  { %203 = vst.msk [vmem:[#allocation2 + $0x30] sm:$0xff] %vm196_vm3, %v185_v7  ;;  %2035 = vmatmul.mubr.msk.f32.gmra.mrb[4].mxu0 %vm358_vm4, %v347_v9  ;;  %v2195_v7 = vpack.c.bf16 %v745_v3, %v744_v2 }
  0x9d   :  { %v311_v10 = vpop.permute.xlu1 %310  ;;  %v187_v11 = vpop.permute.xlu0 %186  ;;  %2196 = vmatprep.subr.bf16.mxu1 %v2195_v7 }
  0x9e   :  { %334 = vst.msk [vmem:[#allocation2 + $0x3f] sm:$0xff] %vm196_vm3, %v311_v10  ;;  %v2199_v10 = vpack.c.bf16 %v747_v8, %v746_v4 }
  0x9f   :  { %205 = vst.msk [vmem:[#allocation2 + $0x38] sm:$0x7f] %vm204_vm6, %v187_v11  ;;  %v748_v11 = vld [vmem:[%s3262_s4 + $0x20] sm:$0xff] }
  0xa1   :  { %v259_v12 = vpop.permute.xlu1 %258  ;;  %v257_v13 = vpop.permute.xlu0 %256 }
  0xa2   :  { %v348_v14 = vld [vmem:[#allocation2 + $0x30] sm:$0xff]  ;;  %280 = vst.msk [vmem:[#allocation2 + $0x4f] sm:$0xff] %vm138_vm2, %v259_v12  ;;  %279 = vst.msk [vmem:[#allocation2 + $0x47] sm:$0xff] %vm138_vm2, %v257_v13  ;;  %v749_v12 = vld [vmem:[%s3262_s4 + $0x28] sm:$0xff] }
  0xa3   :  { %2037 = vmatprep.mubr.msk.f32.mxu0 %vm358_vm4, %v348_v14  ;;  %v2203_v14 = vpack.c.bf16 %v749_v12, %v748_v11 }
  0xa5   :  { %v315_v15 = vpop.permute.xlu1 %314  ;;  %v313_v16 = vpop.permute.xlu0 %312 }
  0xa6   :  { %v349_v17 = vld [vmem:[#allocation2 + $0x38] sm:$0xff]  ;;  %336 = vst.msk [vmem:[#allocation2 + $0x4f] sm:$0xff] %vm196_vm3, %v315_v15  ;;  %335 = vst.msk [vmem:[#allocation2 + $0x47] sm:$0xff] %vm196_vm3, %v313_v16 }
  0xa7   :  { %2038 = vmatmul.mubr.msk.f32.gmra.mrb[6].mxu0 %vm358_vm4, %v349_v17 }
  0xa9   :  { %v263_v18 = vpop.permute.xlu1 %262  ;;  %v261_v19 = vpop.permute.xlu0 %260 }
  0xaa   :  { %282 = vst.msk [vmem:[#allocation2 + $0x5f] sm:$0xff] %vm138_vm2, %v263_v18  ;;  %281 = vst.msk [vmem:[#allocation2 + $0x57] sm:$0xff] %vm138_vm2, %v261_v19 }
  0xad   :  { %v319_v20 = vpop.permute.xlu1 %318  ;;  %v317_v21 = vpop.permute.xlu0 %316  ;;  %v350_v22 = vld [vmem:[#allocation2 + $0x40] sm:$0xff]  ;;  %v351_v23 = vld [vmem:[#allocation2 + $0x48] sm:$0xff] }
  0xae   :  { %338 = vst.msk [vmem:[#allocation2 + $0x5f] sm:$0xff] %vm196_vm3, %v319_v20  ;;  %337 = vst.msk [vmem:[#allocation2 + $0x57] sm:$0xff] %vm196_vm3, %v317_v21  ;;  %2040 = vmatprep.mubr.msk.f32.mxu0 %vm358_vm4, %v350_v22 }
  0xaf   :  { %2041 = vmatmul.mubr.msk.f32.gmra.mrb[8].mxu0 %vm358_vm4, %v351_v23 }
  0xb1   :  { %v267_v24 = vpop.permute.xlu1 %266  ;;  %v265_v25 = vpop.permute.xlu0 %264 }
  0xb2   :  { %284 = vst.msk [vmem:[#allocation2 + $0x6f] sm:$0xff] %vm138_vm2, %v267_v24  ;;  %283 = vst.msk [vmem:[#allocation2 + $0x67] sm:$0xff] %vm138_vm2, %v265_v25  ;;  %vm1611_vm2 = vcmask 781824  }
  0xb5   :  { %v323_v26 = vpop.permute.xlu1 %322  ;;  %v321_v27 = vpop.permute.xlu0 %320  ;;  %v352_v28 = vld [vmem:[#allocation2 + $0x50] sm:$0xff]  ;;  %v353_v29 = vld [vmem:[#allocation2 + $0x58] sm:$0xff] }
  0xb6   :  { %340 = vst.msk [vmem:[#allocation2 + $0x6f] sm:$0xff] %vm196_vm3, %v323_v26  ;;  %339 = vst.msk [vmem:[#allocation2 + $0x67] sm:$0xff] %vm196_vm3, %v321_v27  ;;  %2043 = vmatprep.mubr.msk.f32.mxu0 %vm358_vm4, %v352_v28  ;;  %vm1618_vm3 = vcmask 1044224  }
  0xb7   :  { %2044 = vmatmul.mubr.msk.f32.gmra.mrb[10].mxu0 %vm358_vm4, %v353_v29 }
  0xb9   :  { %v269_v30 = vpop.permute.xlu0 %268  ;;  %v325_v31 = vpop.permute.xlu1 %324 }
  0xba   :  { %285 = vst.msk [vmem:[#allocation2 + $0x77] sm:$0x7f] %vm146_vm5, %v269_v30 }
  0xbb   :  { %341 = vst.msk [vmem:[#allocation2 + $0x77] sm:$0x7f] %vm204_vm6, %v325_v31 }
  0xbd   :  { %v354_v32 = vld [vmem:[#allocation2 + $0x60] sm:$0xff]  ;;  %v355_v33 = vld [vmem:[#allocation2 + $0x68] sm:$0xff] }
  0xbe   :  { %2046 = vmatprep.mubr.msk.f32.mxu1 %vm358_vm4, %v354_v32 }
  0xbf   :  { %2047 = vmatmul.mubr.msk.f32.vlgmr.msra.gmra.mrb[0].mxu1 %vm358_vm4, %v355_v33 }
  0xc0   :  { %2198 = vmatpush3.bf16.msra.mxu1 %v2195_v7 }
  0xc1   :  { %2200 = vmatprep.subr.bf16.mxu1 %v2199_v10 }
  0xc2   :  { %v356_v34 = vld [vmem:[#allocation2 + $0x70] sm:$0xff]  ;;  %v357_v35 = vld [vmem:[#allocation2 + $0x78] sm:$0x3f] }
  0xc3   :  { %2049 = vmatprep.mubr.msk.f32.mxu1 %vm358_vm4, %v356_v34 }
  0xc4   :  { %2050 = vmatmul.mubr.msk.f32.gmra.mrb[2].mxu1 %vm358_vm4, %v357_v35  ;;  %vm1836_vm4 = vcmask 130048  }
  0xc5   :  { %2202 = vmatpush3.bf16.msra.mxu1 %v2199_v10 }
  0xc6   :  { %2204 = vmatprep.subr.bf16.mxu1 %v2203_v14 }
  0xc9   :  { %2206 = vmatpush3.bf16.msra.mxu1 %v2203_v14 }
 0x15e   :  { %v2697_v36 = vpop.f32.mrb[0].mxu0 }
 0x15f   :  { %v554_v37 = vsel %vm552_vm7, %v2697_v36, 0.0  ;;  %v592_v38 = vmul.f32 %v2697_v36, %v2697_v36  ;;  %v2703_v39 = vpop.f32.mrb[1].mxu0 }
 0x160   :  { %v553_v40 = vsel %vm552_vm7, %v2703_v39, 0.0  ;;  %v591_v41 = vmul.f32 %v2703_v39, %v2703_v39 }
 0x161   :  { %v608_v42 = vsel %vm552_vm7, %v592_v38, 0.0  ;;  %v555_v43 = vadd.f32 %v554_v37, %v553_v40 }
 0x162   :  { %v607_v44 = vsel %vm552_vm7, %v591_v41, 0.0 }
 0x163   :  { %v609_v45 = vadd.f32 %v608_v42, %v607_v44 }
 0x166   :  { %v2711_v46 = vpop.f32.mrb[2].mxu0 }
 0x167   :  { %v2713_v47 = vpop.f32.mrb[3].mxu0  ;;  %v594_v48 = vmul.f32 %v2711_v46, %v2711_v46  ;;  %v558_v52 = vsel %vm552_vm7, %v2711_v46, 0.0 }
 0x168   :  { %v556_v49 = vsel %vm552_vm7, %v2713_v47, 0.0  ;;  %v593_v50 = vmul.f32 %v2713_v47, %v2713_v47 }
 0x169   :  { %v557_v51 = vadd.f32 %v556_v49, %v555_v43  ;;  %v612_v56 = vsel %vm552_vm7, %v594_v48, 0.0 }
 0x16a   :  { %v610_v53 = vsel %vm552_vm7, %v593_v50, 0.0 }
 0x16b   :  { %v611_v54 = vadd.f32 %v610_v53, %v609_v45  ;;  %v559_v55 = vadd.f32 %v558_v52, %v557_v51 }
 0x16d   :  { %v613_v57 = vadd.f32 %v612_v56, %v611_v54 }
 0x16e   :  { %v2725_v58 = vpop.f32.mrb[4].mxu0 }
 0x16f   :  { %v2727_v59 = vpop.f32.mrb[5].mxu0  ;;  %v596_v60 = vmul.f32 %v2725_v58, %v2725_v58  ;;  %v562_v0 = vsel %vm552_vm7, %v2725_v58, 0.0 }
 0x170   :  { %v560_v61 = vsel %vm552_vm7, %v2727_v59, 0.0  ;;  %v595_v62 = vmul.f32 %v2727_v59, %v2727_v59 }
 0x171   :  { %v561_v63 = vadd.f32 %v560_v61, %v559_v55  ;;  %v616_v9 = vsel %vm552_vm7, %v596_v60, 0.0 }
 0x172   :  { %v614_v1 = vsel %vm552_vm7, %v595_v62, 0.0 }
 0x173   :  { %v615_v5 = vadd.f32 %v614_v1, %v613_v57  ;;  %v563_v6 = vadd.f32 %v562_v0, %v561_v63 }
 0x175   :  { %v617_v13 = vadd.f32 %v616_v9, %v615_v5 }
 0x17a   :  { %v2757_v15 = vpop.f32.mrb[6].mxu0 }
 0x17b   :  { %v2759_v16 = vpop.f32.mrb[7].mxu0  ;;  %v598_v17 = vmul.f32 %v2757_v15, %v2757_v15  ;;  %v566_v21 = vsel %vm552_vm7, %v2757_v15, 0.0 }
 0x17c   :  { %v564_v18 = vsel %vm552_vm7, %v2759_v16, 0.0  ;;  %v597_v19 = vmul.f32 %v2759_v16, %v2759_v16 }
 0x17d   :  { %v565_v20 = vadd.f32 %v564_v18, %v563_v6  ;;  %v620_v25 = vsel %vm552_vm7, %v598_v17, 0.0 }
 0x17e   :  { %v618_v22 = vsel %vm552_vm7, %v597_v19, 0.0 }
 0x17f   :  { %v619_v23 = vadd.f32 %v618_v22, %v617_v13  ;;  %v567_v24 = vadd.f32 %v566_v21, %v565_v20 }
 0x181   :  { %v621_v26 = vadd.f32 %v620_v25, %v619_v23 }
 0x182   :  { %v2771_v27 = vpop.f32.mrb[8].mxu0 }
 0x183   :  { %v2773_v28 = vpop.f32.mrb[9].mxu0  ;;  %v600_v29 = vmul.f32 %v2771_v27, %v2771_v27  ;;  %v570_v33 = vsel %vm552_vm7, %v2771_v27, 0.0 }
 0x184   :  { %v568_v30 = vsel %vm552_vm7, %v2773_v28, 0.0  ;;  %v599_v31 = vmul.f32 %v2773_v28, %v2773_v28 }
 0x185   :  { %v569_v32 = vadd.f32 %v568_v30, %v567_v24  ;;  %v624_v38 = vsel %vm552_vm7, %v600_v29, 0.0 }
 0x186   :  { %v622_v34 = vsel %vm552_vm7, %v599_v31, 0.0 }
 0x187   :  { %v623_v35 = vadd.f32 %v622_v34, %v621_v26  ;;  %v571_v37 = vadd.f32 %v570_v33, %v569_v32 }
 0x189   :  { %v625_v40 = vadd.f32 %v624_v38, %v623_v35 }
 0x18a   :  { %v2785_v41 = vpop.f32.mrb[10].mxu0 }
 0x18b   :  { %v2787_v42 = vpop.f32.mrb[11].mxu0  ;;  %v602_v43 = vmul.f32 %v2785_v41, %v2785_v41  ;;  %v574_v49 = vsel %vm552_vm7, %v2785_v41, 0.0 }
 0x18c   :  { %v572_v44 = vsel %vm552_vm7, %v2787_v42, 0.0  ;;  %v601_v45 = vmul.f32 %v2787_v42, %v2787_v42 }
 0x18d   :  { %v573_v48 = vadd.f32 %v572_v44, %v571_v37  ;;  %v628_v53 = vsel %vm552_vm7, %v602_v43, 0.0  ;;  %v654_v43 = vlaneseq }
 0x18e   :  { %v626_v50 = vsel %vm552_vm7, %v601_v45, 0.0  ;;  %v63_v45 = vld [vmem:[%s3284_s2] sm:$0x1] }
 0x18f   :  { %v627_v51 = vadd.f32 %v626_v50, %v625_v40  ;;  %v575_v52 = vadd.f32 %v574_v49, %v573_v48  ;;  %v655_v44 = vshrl.u32 %v654_v43, 7 }
 0x191   :  { %v629_v54 = vadd.f32 %v628_v53, %v627_v51  ;;  %v2825_v48 = vsub.s32 0, %v655_v44  ;;  %v64_v51 = vld [vmem:[%s3261_s3] sm:$0x1] }
 0x192   :  { %v2799_v55 = vpop.f32.mrb[0].mxu1 }
 0x193   :  { %v2801_v56 = vpop.f32.mrb[1].mxu1  ;;  %v604_v57 = vmul.f32 %v2799_v55, %v2799_v55  ;;  %v578_v63 = vsel %vm552_vm7, %v2799_v55, 0.0 }
 0x194   :  { %v576_v60 = vsel %vm552_vm7, %v2801_v56, 0.0  ;;  %v603_v61 = vmul.f32 %v2801_v56, %v2801_v56 }
 0x195   :  { %v577_v62 = vadd.f32 %v576_v60, %v575_v52  ;;  %v632_v4 = vsel %vm552_vm7, %v604_v57, 0.0 }
 0x196   :  { %v630_v0 = vsel %vm552_vm7, %v603_v61, 0.0 }
 0x197   :  { %v631_v1 = vadd.f32 %v630_v0, %v629_v54  ;;  %v2812_v2 = vpop.f32.mrb[2].mxu1  ;;  %v579_v3 = vadd.f32 %v578_v63, %v577_v62 }
 0x198   :  { %v543_v5 = vpop.f32.mrb[3].mxu1  ;;  %v606_v6 = vmul.f32 %v2812_v2, %v2812_v2  ;;  %v583_v11 = vsel %vm582_vm8, %v2812_v2, 0.0 }
 0x199   :  { %v580_v7 = vsel %vm552_vm7, %v543_v5, 0.0  ;;  %v605_v8 = vmul.f32 %v543_v5, %v543_v5  ;;  %v633_v9 = vadd.f32 %v632_v4, %v631_v1 }
 0x19a   :  { %v581_v10 = vadd.f32 %v580_v7, %v579_v3  ;;  %v636_v17 = vsel %vm582_vm8, %v606_v6, 0.0 }
 0x19b   :  { %v634_v12 = vsel %vm552_vm7, %v605_v8, 0.0 }
 0x19c   :  { %v584_v13 = vadd.f32 %v583_v11, %v581_v10  ;;  %v635_v14 = vadd.f32 %v634_v12, %v633_v9 }
 0x19e   :  { %v585_v18 = vrot.slane %v584_v13, 4  ;;  %v637_v19 = vadd.f32 %v636_v17, %v635_v14 }
 0x1a0   :  { %v586_v20 = vadd.f32 %v585_v18, %v584_v13  ;;  %v638_v21 = vrot.slane %v637_v19, 4 }
 0x1a2   :  { %v587_v22 = vrot.slane %v586_v20, 2  ;;  %v639_v23 = vadd.f32 %v638_v21, %v637_v19 }
 0x1a4   :  { %v588_v24 = vadd.f32 %v587_v22, %v586_v20  ;;  %v640_v25 = vrot.slane %v639_v23, 2 }
 0x1a6   :  { %v589_v26 = vrot.slane %v588_v24, 1  ;;  %v641_v29 = vadd.f32 %v640_v25, %v639_v23 }
 0x1a8   :  { %v590_v30 = vadd.f32 %v589_v26, %v588_v24  ;;  %v642_v31 = vrot.slane %v641_v29, 1 }
 0x1aa   :  { %v643_v32 = vadd.f32 %v642_v31, %v641_v29  ;;  %v644_v33 = vmul.f32 0.007936508, %v590_v30 }
 0x1ac   :  { %v645_v34 = vmul.f32 0.007936508, %v643_v32  ;;  %v646_v35 = vmul.f32 %v644_v33, %v644_v33 }
 0x1ae   :  { %v647_v37 = vsub.f32 %v645_v34, %v646_v35  ;;  %v750_v34 = vld [vmem:[%s3262_s4 + $0x30] sm:$0xff]  ;;  %v751_v35 = vld [vmem:[%s3262_s4 + $0x38] sm:$0xff] }
 0x1b0   :  { %v648_v38 = vmax.f32 %v647_v37, 0.0 }
 0x1b2   :  { %v649_v40 = vadd.f32 1e-05, %v648_v38 }
 0x1b4   :  { %2310 = vrsqrt.f32 %v649_v40 }
 0x1be   :  { %v2311_v49 = vpop.eup %2310 }
 0x1bf   :  { %v651_v50 = vmul.f32 %v2311_v49, %v63_v45 }
 0x1c1   :  { %v652_v52 = vmul.f32 %v651_v50, %v644_v33  ;;  %v2831_v53 = vrot.slane %v651_v50, %v2825_v48  ;;  %v752_v50 = vld [vmem:[%s3262_s4 + $0x40] sm:$0xff] }
 0x1c3   :  { %v653_v54 = vsub.f32 %v64_v51, %v652_v52  ;;  %v672_v57 = vmul.f32 %v2831_v53, %v543_v5  ;;  %v660_v60 = vmul.f32 %v2831_v53, %v2713_v47  ;;  %v661_v61 = vmul.f32 %v2711_v46, %v2831_v53  ;;  %v753_v51 = vld [vmem:[%s3262_s4 + $0x48] sm:$0xff] }
 0x1c4   :  { %v658_v62 = vmul.f32 %v2831_v53, %v2703_v39  ;;  %v659_v63 = vmul.f32 %v2697_v36, %v2831_v53  ;;  %v662_v0 = vmul.f32 %v2831_v53, %v2727_v59  ;;  %v664_v1 = vmul.f32 %v2831_v53, %v2759_v16 }
 0x1c5   :  { %v2847_v3 = vrot.slane %v653_v54, %v2825_v48  ;;  %v665_v47 = vmul.f32 %v2757_v15, %v2831_v53  ;;  %v663_v46 = vmul.f32 %v2725_v58, %v2831_v53  ;;  %v666_v39 = vmul.f32 %v2831_v53, %v2773_v28 }
 0x1c6   :  { %v667_v36 = vmul.f32 %v2771_v27, %v2831_v53  ;;  %v670_v59 = vmul.f32 %v2831_v53, %v2801_v56  ;;  %v671_v16 = vmul.f32 %v2799_v55, %v2831_v53  ;;  %v668_v4 = vmul.f32 %v2831_v53, %v2787_v42 }
 0x1c7   :  { %v694_v15 = vadd.f32 %v2847_v3, %v672_v57  ;;  %v682_v5 = vadd.f32 %v2847_v3, %v660_v60  ;;  %v683_v58 = vadd.f32 %v2847_v3, %v661_v61  ;;  %v680_v28 = vadd.f32 %v2847_v3, %v658_v62 }
 0x1c8   :  { %v681_v6 = vadd.f32 %v2847_v3, %v659_v63  ;;  %v684_v27 = vadd.f32 %v2847_v3, %v662_v0  ;;  %v686_v56 = vadd.f32 %v2847_v3, %v664_v1  ;;  %v687_v7 = vadd.f32 %v2847_v3, %v665_v47  ;;  %v755_v63 = vld [vmem:[%s3262_s4 + $0x58] sm:$0xff] }
 0x1c9   :  { %v710_v55 = vmul.f32 0.01, %v694_v15  ;;  %v698_v8 = vmul.f32 0.01, %v682_v5  ;;  %v699_v9 = vmul.f32 0.01, %v683_v58  ;;  %v685_v42 = vadd.f32 %v2847_v3, %v663_v46 }
 0x1ca   :  { %v696_v10 = vmul.f32 0.01, %v680_v28  ;;  %v697_v11 = vmul.f32 0.01, %v681_v6  ;;  %v700_v12 = vmul.f32 0.01, %v684_v27  ;;  %v688_v13 = vadd.f32 %v2847_v3, %v666_v39 }
 0x1cb   :  { %v726_v14 = vmax.f32 %v694_v15, %v710_v55  ;;  %v714_v17 = vmax.f32 %v682_v5, %v698_v8  ;;  %v715_v18 = vmax.f32 %v683_v58, %v699_v9  ;;  %v702_v19 = vmul.f32 0.01, %v686_v56 }
 0x1cc   :  { %v712_v20 = vmax.f32 %v680_v28, %v696_v10  ;;  %v713_v21 = vmax.f32 %v681_v6, %v697_v11  ;;  %v716_v22 = vmax.f32 %v684_v27, %v700_v12  ;;  %v703_v23 = vmul.f32 0.01, %v687_v7 }
 0x1cd   :  { %742 = vst.msk [vmem:[#allocation3 + $0x70] sm:$0xff] %vm552_vm7, %v726_v14  ;;  %730 = vst.msk [vmem:[#allocation3 + $0x10] sm:$0xff] %vm552_vm7, %v714_v17  ;;  %v718_v24 = vmax.f32 %v686_v56, %v702_v19  ;;  %v701_v25 = vmul.f32 0.01, %v685_v42  ;;  %v689_v26 = vadd.f32 %v2847_v3, %v667_v36  ;;  %v704_v29 = vmul.f32 0.01, %v688_v13 }
 0x1ce   :  { %731 = vst.msk [vmem:[#allocation3 + $0x18] sm:$0xff] %vm552_vm7, %v715_v18  ;;  %728 = vst.msk [vmem:[#allocation3] sm:$0xff] %vm552_vm7, %v712_v20  ;;  %v719_v30 = vmax.f32 %v687_v7, %v703_v23  ;;  %v692_v31 = vadd.f32 %v2847_v3, %v670_v59  ;;  %v693_v32 = vadd.f32 %v2847_v3, %v671_v16 }
 0x1cf   :  { %729 = vst.msk [vmem:[#allocation3 + $0x8] sm:$0xff] %vm552_vm7, %v713_v21  ;;  %732 = vst.msk [vmem:[#allocation3 + $0x20] sm:$0xff] %vm552_vm7, %v716_v22  ;;  %v669_v33 = vmul.f32 %v2785_v41, %v2831_v53  ;;  %v717_v37 = vmax.f32 %v685_v42, %v701_v25  ;;  %v705_v38 = vmul.f32 0.01, %v689_v26  ;;  %v720_v40 = vmax.f32 %v688_v13, %v704_v29 }
 0x1d0   :  { %734 = vst.msk [vmem:[#allocation3 + $0x30] sm:$0xff] %vm552_vm7, %v718_v24  ;;  %v690_v43 = vadd.f32 %v2847_v3, %v668_v4  ;;  %735 = vst.msk [vmem:[#allocation3 + $0x38] sm:$0xff] %vm552_vm7, %v719_v30  ;;  %v708_v44 = vmul.f32 0.01, %v692_v31  ;;  %v709_v45 = vmul.f32 0.01, %v693_v32  ;;  %v673_v49 = vmul.f32 %v2812_v2, %v2831_v53 }
 0x1d1   :  { %v691_v41 = vadd.f32 %v2847_v3, %v669_v33  ;;  %733 = vst.msk [vmem:[#allocation3 + $0x28] sm:$0xff] %vm552_vm7, %v717_v37  ;;  %v721_v52 = vmax.f32 %v689_v26, %v705_v38  ;;  %736 = vst.msk [vmem:[#allocation3 + $0x40] sm:$0xff] %vm552_vm7, %v720_v40  ;;  %v2207_v57 = vpack.c.bf16 %v751_v35, %v750_v34  ;;  %v754_v53 = vld [vmem:[%s3262_s4 + $0x50] sm:$0xff]  ;;  %s2347_s4 = smov 64  }
 0x1d2   :  { %v706_v54 = vmul.f32 0.01, %v690_v43  ;;  %v724_v60 = vmax.f32 %v692_v31, %v708_v44  ;;  %v725_v61 = vmax.f32 %v693_v32, %v709_v45  ;;  %v695_v2 = vadd.f32 %v2847_v3, %v673_v49 }
 0x1d3   :  { %v707_v62 = vmul.f32 0.01, %v691_v41  ;;  %737 = vst.msk [vmem:[#allocation3 + $0x48] sm:$0xff] %vm552_vm7, %v721_v52  ;;  %2208 = vmatprep.subr.bf16.mxu1 %v2207_v57  ;;  %v2211_v1 = vpack.c.bf16 %v753_v51, %v752_v50  ;;  %v2215_v59 = vpack.c.bf16 %v755_v63, %v754_v53  ;;  %v1146_v52 = vld [vmem:[%s3265_s7] sm:$0xff] }
 0x1d4   :  { %v722_v0 = vmax.f32 %v690_v43, %v706_v54  ;;  %740 = vst.msk [vmem:[#allocation3 + $0x60] sm:$0xff] %vm552_vm7, %v724_v60  ;;  %741 = vst.msk [vmem:[#allocation3 + $0x68] sm:$0xff] %vm552_vm7, %v725_v61  ;;  %v711_v3 = vmul.f32 0.01, %v695_v2  ;;  %2210 = vmatpush3.bf16.msra.mxu1 %v2207_v57  ;;  %v1147_v54 = vld [vmem:[%s3265_s7 + $0x8] sm:$0xff]  ;;  %v1148_v57 = vld [vmem:[%s3265_s7 + $0x10] sm:$0xff] }
 0x1d5   :  { %v773_v47 = vld [vmem:[#allocation3 + $0x11] ss:$2 sm:$0xff]  ;;  %v723_v46 = vmax.f32 %v691_v41, %v707_v62  ;;  %v760_v39 = vld [vmem:[#allocation3 + $0x10] ss:$2 sm:$0xff]  ;;  %2212 = vmatprep.subr.bf16.mxu1 %v2211_v1  ;;  %v2219_v60 = vpack.c.bf16 %v1147_v54, %v1146_v52 }
 0x1d6   :  { %784 = vrot.lane.b32.xlu1 %v773_v47, %s2346_s22  ;;  %v771_v36 = vld [vmem:[#allocation3 + $0x1] ss:$2 sm:$0xff]  ;;  %738 = vst.msk [vmem:[#allocation3 + $0x50] sm:$0xff] %vm552_vm7, %v722_v0  ;;  %766 = vst.msk [vmem:[#allocation4 + $0x8] sm:$0xff] %vm552_vm7, %v760_v39  ;;  %v727_v16 = vmax.f32 %v695_v2, %v711_v3  ;;  %v758_v4 = vld [vmem:[#allocation3] ss:$2 sm:$0xff] }
 0x1d7   :  { %782 = vrot.lane.b32.xlu0 %v771_v36, %s2346_s22  ;;  %739 = vst.msk [vmem:[#allocation3 + $0x58] sm:$0xff] %vm552_vm7, %v723_v46  ;;  %765 = vst.msk [vmem:[#allocation4] sm:$0xff] %vm552_vm7, %v758_v4  ;;  %v803_v15 = vld [vmem:[#allocation3 + $0x12] ss:$2 sm:$0xff]  ;;  %v801_v58 = vld [vmem:[#allocation3 + $0x2] ss:$2 sm:$0xff]  ;;  %2220 = vmatprep.subr.bf16.mxu0 %v2219_v60 }
 0x1d8   :  { %743 = vst.msk [vmem:[#allocation3 + $0x78] sm:$0x3f] %vm582_vm8, %v727_v16  ;;  %2214 = vmatpush3.bf16.msra.mxu1 %v2211_v1  ;;  %v762_v5 = vld [vmem:[#allocation3 + $0x20] ss:$2 sm:$0xff]  ;;  %v775_v56 = vld [vmem:[#allocation3 + $0x21] ss:$2 sm:$0xff]  ;;  %2222 = vmatpush3.bf16.msra.mxu0 %v2219_v60 }
 0x1d9   :  { %v764_v28 = vld [vmem:[#allocation3 + $0x30] ss:$2 sm:$0x7f]  ;;  %767 = vst.msk [vmem:[#allocation4 + $0x10] sm:$0xff] %vm552_vm7, %v762_v5  ;;  %2216 = vmatprep.subr.bf16.mxu1 %v2215_v59 }
 0x1da   :  { %814 = vrot.lane.b32.xlu1 %v803_v15, %s2347_s4  ;;  %769 = vst.msk [vmem:[#allocation4 + $0x18] sm:$0x7f] %vm768_vm9, %v764_v28  ;;  %v831_v6 = vld [vmem:[#allocation3 + $0x3f] ss:$2 sm:$0xff]  ;;  %v843_v8 = vld [vmem:[#allocation3 + $0x40] ss:$2 sm:$0xff] }
 0x1db   :  { %812 = vrot.lane.b32.xlu0 %v801_v58, %s2347_s4  ;;  %838 = vst.msk [vmem:[#allocation4 + $0x1f] sm:$0xff] %vm552_vm7, %v831_v6  ;;  %v777_v27 = vld [vmem:[#allocation3 + $0x31] ss:$2 sm:$0x7f]  ;;  %v805_v42 = vld [vmem:[#allocation3 + $0x22] ss:$2 sm:$0xff] }
 0x1dc   :  { %2218 = vmatpush3.bf16.msra.mxu1 %v2215_v59  ;;  %v871_v10 = vld [vmem:[#allocation3 + $0x41] ss:$2 sm:$0xff]  ;;  %v807_v11 = vld [vmem:[#allocation3 + $0x32] ss:$2 sm:$0x7f] }
 0x1dd   :  { %v847_v12 = vld [vmem:[#allocation3 + $0x60] ss:$2 sm:$0xff]  ;;  %v875_v14 = vld [vmem:[#allocation3 + $0x61] ss:$2 sm:$0xff]  ;;  %v1149_v61 = vld [vmem:[%s3265_s7 + $0x18] sm:$0xff] }
 0x1de   :  { %788 = vrot.lane.b32.xlu1 %v777_v27, %s2346_s22  ;;  %v835_v7 = vld [vmem:[#allocation3 + $0x5f] ss:$2 sm:$0xff]  ;;  %v833_v55 = vld [vmem:[#allocation3 + $0x4f] ss:$2 sm:$0xff]  ;;  %v845_v13 = vld [vmem:[#allocation3 + $0x50] ss:$2 sm:$0xff]  ;;  %v2223_v62 = vpack.c.bf16 %v1149_v61, %v1148_v57 }
 0x1df   :  { %786 = vrot.lane.b32.xlu0 %v775_v56, %s2346_s22  ;;  %840 = vst.msk [vmem:[#allocation4 + $0x2f] sm:$0xff] %vm552_vm7, %v835_v7  ;;  %839 = vst.msk [vmem:[#allocation4 + $0x27] sm:$0xff] %vm552_vm7, %v833_v55  ;;  %v837_v9 = vld [vmem:[#allocation3 + $0x6f] ss:$2 sm:$0x7f] }
 0x1e0   :  { %841 = vst.msk [vmem:[#allocation4 + $0x37] sm:$0x7f] %vm768_vm9, %v837_v9  ;;  %v873_v17 = vld [vmem:[#allocation3 + $0x51] ss:$2 sm:$0xff]  ;;  %2224 = vmatprep.subr.bf16.mxu0 %v2223_v62 }
 0x1e1   :  { %v877_v18 = vld [vmem:[#allocation3 + $0x71] ss:$2 sm:$0x7f]  ;;  %v849_v19 = vld [vmem:[#allocation3 + $0x70] ss:$2 sm:$0x7f]  ;;  %2226 = vmatpush3.bf16.msra.mxu0 %v2223_v62 }
 0x1e2   :  { %854 = vrot.lane.b32.xlu1 %v843_v8, %s2346_s22 }
 0x1e3   :  { %816 = vrot.lane.b32.xlu0 %v805_v42, %s2347_s4 }
 0x1e6   :  { %882 = vrot.lane.b32.xlu1 %v871_v10, %s2347_s4 }
 0x1e7   :  { %818 = vrot.lane.b32.xlu0 %v807_v11, %s2347_s4 }
 0x1ea   :  { %858 = vrot.lane.b32.xlu1 %v847_v12, %s2346_s22 }
 0x1eb   :  { %856 = vrot.lane.b32.xlu0 %v845_v13, %s2346_s22 }
 0x1ee   :  { %886 = vrot.lane.b32.xlu1 %v875_v14, %s2347_s4 }
 0x1ef   :  { %884 = vrot.lane.b32.xlu0 %v873_v17, %s2347_s4 }
 0x1f2   :  { %888 = vrot.lane.b32.xlu1 %v877_v18, %s2347_s4 }
 0x1f3   :  { %860 = vrot.lane.b32.xlu0 %v849_v19, %s2346_s22 }
 0x248   :  { %v785_v20 = vpop.permute.xlu1 %784 }
 0x249   :  { %796 = vst.msk [vmem:[#allocation4 + $0x8] sm:$0xff] %vm794_vm10, %v785_v20  ;;  %v783_v21 = vpop.permute.xlu0 %782 }
 0x24a   :  { %795 = vst.msk [vmem:[#allocation4] sm:$0xff] %vm794_vm10, %v783_v21 }
 0x24c   :  { %v815_v22 = vpop.permute.xlu1 %814 }
 0x24d   :  { %826 = vst.msk [vmem:[#allocation4 + $0x8] sm:$0xff] %vm824_vm11, %v815_v22  ;;  %v813_v23 = vpop.permute.xlu0 %812 }
 0x24e   :  { %825 = vst.msk [vmem:[#allocation4] sm:$0xff] %vm824_vm11, %v813_v23 }
 0x250   :  { %v789_v24 = vpop.permute.xlu1 %788 }
 0x251   :  { %799 = vst.msk [vmem:[#allocation4 + $0x18] sm:$0x7f] %vm798_vm12, %v789_v24  ;;  %v787_v25 = vpop.permute.xlu0 %786 }
 0x252   :  { %797 = vst.msk [vmem:[#allocation4 + $0x10] sm:$0xff] %vm794_vm10, %v787_v25 }
 0x254   :  { %v855_v26 = vpop.permute.xlu1 %854  ;;  %v899_v29 = vld [vmem:[#allocation4 + $0x8] sm:$0xff] }
 0x255   :  { %866 = vst.msk [vmem:[#allocation4 + $0x1f] sm:$0xff] %vm794_vm10, %v855_v26  ;;  %v817_v30 = vpop.permute.xlu0 %816  ;;  %v898_v31 = vld [vmem:[#allocation4] sm:$0xff] }
 0x256   :  { %827 = vst.msk [vmem:[#allocation4 + $0x10] sm:$0xff] %vm824_vm11, %v817_v30  ;;  %2076 = vmatprep.mubr.msk.f32.mxu1 %vm906_vm13, %v898_v31 }
 0x257   :  { %2077 = vmatmul.mubr.msk.f32.vlgmr.msra.gmra.mrb[4].mxu1 %vm906_vm13, %v899_v29 }
 0x258   :  { %v883_v32 = vpop.permute.xlu1 %882 }
 0x259   :  { %894 = vst.msk [vmem:[#allocation4 + $0x1f] sm:$0xff] %vm824_vm11, %v883_v32  ;;  %v819_v33 = vpop.permute.xlu0 %818 }
 0x25a   :  { %829 = vst.msk [vmem:[#allocation4 + $0x18] sm:$0x7f] %vm828_vm14, %v819_v33 }
 0x25c   :  { %v859_v34 = vpop.permute.xlu1 %858 }
 0x25d   :  { %868 = vst.msk [vmem:[#allocation4 + $0x2f] sm:$0xff] %vm794_vm10, %v859_v34  ;;  %v857_v35 = vpop.permute.xlu0 %856  ;;  %v900_v37 = vld [vmem:[#allocation4 + $0x10] sm:$0xff] }
 0x25e   :  { %867 = vst.msk [vmem:[#allocation4 + $0x27] sm:$0xff] %vm794_vm10, %v857_v35  ;;  %2079 = vmatprep.mubr.msk.f32.mxu1 %vm906_vm13, %v900_v37 }
 0x260   :  { %v887_v38 = vpop.permute.xlu1 %886 }
 0x261   :  { %896 = vst.msk [vmem:[#allocation4 + $0x2f] sm:$0xff] %vm824_vm11, %v887_v38  ;;  %v885_v40 = vpop.permute.xlu0 %884  ;;  %v901_v43 = vld [vmem:[#allocation4 + $0x18] sm:$0xff] }
 0x262   :  { %895 = vst.msk [vmem:[#allocation4 + $0x27] sm:$0xff] %vm824_vm11, %v885_v40  ;;  %2080 = vmatmul.mubr.msk.f32.gmra.mrb[6].mxu1 %vm906_vm13, %v901_v43 }
 0x264   :  { %v889_v44 = vpop.permute.xlu1 %888 }
 0x265   :  { %v861_v45 = vpop.permute.xlu0 %860 }
 0x266   :  { %869 = vst.msk [vmem:[#allocation4 + $0x37] sm:$0x7f] %vm798_vm12, %v861_v45 }
 0x267   :  { %897 = vst.msk [vmem:[#allocation4 + $0x37] sm:$0x7f] %vm828_vm14, %v889_v44 }
 0x269   :  { %v902_v41 = vld [vmem:[#allocation4 + $0x20] sm:$0xff]  ;;  %v903_v49 = vld [vmem:[#allocation4 + $0x28] sm:$0xff] }
 0x26a   :  { %2082 = vmatprep.mubr.msk.f32.mxu1 %vm906_vm13, %v902_v41 }
 0x26b   :  { %2083 = vmatmul.mubr.msk.f32.gmra.mrb[8].mxu1 %vm906_vm13, %v903_v49 }
 0x26e   :  { %v904_v50 = vld [vmem:[#allocation4 + $0x30] sm:$0xff]  ;;  %v905_v51 = vld [vmem:[#allocation4 + $0x38] sm:$0x3f] }
 0x26f   :  { %2085 = vmatprep.mubr.msk.f32.mxu1 %vm906_vm13, %v904_v50 }
 0x270   :  { %2086 = vmatmul.mubr.msk.f32.gmra.mrb[10].mxu1 %vm906_vm13, %v905_v51 }
 0x32a   :  { %v2977_v2 = vpop.f32.mrb[4].mxu1 }
 0x32b   :  { %v1037_v53 = vsel %vm552_vm7, %v2977_v2, 0.0  ;;  %v1058_v63 = vmul.f32 %v2977_v2, %v2977_v2  ;;  %v2983_v0 = vpop.f32.mrb[5].mxu1 }
 0x32c   :  { %v1036_v1 = vsel %vm552_vm7, %v2983_v0, 0.0  ;;  %v1057_v47 = vmul.f32 %v2983_v0, %v2983_v0 }
 0x32d   :  { %v1066_v46 = vsel %vm552_vm7, %v1058_v63, 0.0  ;;  %v1038_v3 = vadd.f32 %v1037_v53, %v1036_v1  ;;  %v756_v63 = vld [vmem:[%s3263_s5] sm:$0x1] }
 0x32e   :  { %v1065_v39 = vsel %vm552_vm7, %v1057_v47, 0.0 }
 0x32f   :  { %v1067_v36 = vadd.f32 %v1066_v46, %v1065_v39  ;;  %v757_v46 = vld [vmem:[%s3264_s6] sm:$0x1] }
 0x335   :  { %v2991_v59 = vpop.f32.mrb[6].mxu1 }
 0x336   :  { %v1007_v16 = vpop.f32.mrb[7].mxu1  ;;  %v1060_v4 = vmul.f32 %v2991_v59, %v2991_v59  ;;  %v1041_v28 = vsel %vm552_vm7, %v2991_v59, 0.0 }
 0x337   :  { %v1039_v15 = vsel %vm552_vm7, %v1007_v16, 0.0  ;;  %v1059_v5 = vmul.f32 %v1007_v16, %v1007_v16 }
 0x338   :  { %v1040_v58 = vadd.f32 %v1039_v15, %v1038_v3  ;;  %v1070_v7 = vsel %vm552_vm7, %v1060_v4, 0.0 }
 0x339   :  { %v1068_v6 = vsel %vm552_vm7, %v1059_v5, 0.0 }
 0x33a   :  { %v1069_v27 = vadd.f32 %v1068_v6, %v1067_v36  ;;  %v1042_v56 = vadd.f32 %v1041_v28, %v1040_v58 }
 0x33c   :  { %v1071_v55 = vadd.f32 %v1070_v7, %v1069_v27 }
 0x33e   :  { %v2084_v8 = vpop.f32.mrb[8].mxu1 }
 0x33f   :  { %v1017_v9 = vpop.f32.mrb[9].mxu1  ;;  %v1062_v42 = vmul.f32 %v2084_v8, %v2084_v8  ;;  %v1045_v13 = vsel %vm552_vm7, %v2084_v8, 0.0 }
 0x340   :  { %v1043_v10 = vsel %vm552_vm7, %v1017_v9, 0.0  ;;  %v1061_v11 = vmul.f32 %v1017_v9, %v1017_v9 }
 0x341   :  { %v1044_v12 = vadd.f32 %v1043_v10, %v1042_v56  ;;  %v1074_v20 = vsel %vm552_vm7, %v1062_v42, 0.0 }
 0x342   :  { %v1072_v14 = vsel %vm552_vm7, %v1061_v11, 0.0 }
 0x343   :  { %v1073_v17 = vadd.f32 %v1072_v14, %v1071_v55  ;;  %v2087_v18 = vpop.f32.mrb[10].mxu1  ;;  %v1046_v19 = vadd.f32 %v1045_v13, %v1044_v12 }
 0x344   :  { %v1027_v21 = vpop.f32.mrb[11].mxu1  ;;  %v1064_v22 = vmul.f32 %v2087_v18, %v2087_v18  ;;  %v1049_v29 = vsel %vm582_vm8, %v2087_v18, 0.0 }
 0x345   :  { %v1047_v23 = vsel %vm552_vm7, %v1027_v21, 0.0  ;;  %v1063_v24 = vmul.f32 %v1027_v21, %v1027_v21  ;;  %v1075_v25 = vadd.f32 %v1074_v20, %v1073_v17 }
 0x346   :  { %v1048_v26 = vadd.f32 %v1047_v23, %v1046_v19  ;;  %v1078_v33 = vsel %vm582_vm8, %v1064_v22, 0.0  ;;  %v1151_v23 = vld [vmem:[%s3265_s7 + $0x28] sm:$0xff] }
 0x347   :  { %v1076_v30 = vsel %vm552_vm7, %v1063_v24, 0.0 }
 0x348   :  { %v1050_v31 = vadd.f32 %v1049_v29, %v1048_v26  ;;  %v1077_v32 = vadd.f32 %v1076_v30, %v1075_v25 }
 0x34a   :  { %v1051_v34 = vrot.slane %v1050_v31, 4  ;;  %v1079_v35 = vadd.f32 %v1078_v33, %v1077_v32  ;;  %v1152_v32 = vld [vmem:[%s3265_s7 + $0x30] sm:$0xff]  ;;  %v1153_v33 = vld [vmem:[%s3265_s7 + $0x38] sm:$0xff] }
 0x34c   :  { %v1052_v37 = vadd.f32 %v1051_v34, %v1050_v31  ;;  %v1080_v38 = vrot.slane %v1079_v35, 4 }
 0x34e   :  { %v1053_v40 = vrot.slane %v1052_v37, 2  ;;  %v1081_v43 = vadd.f32 %v1080_v38, %v1079_v35  ;;  %v2231_v35 = vpack.c.bf16 %v1153_v33, %v1152_v32  ;;  %v1155_v38 = vld [vmem:[%s3265_s7 + $0x48] sm:$0xff] }
 0x350   :  { %v1054_v44 = vadd.f32 %v1053_v40, %v1052_v37  ;;  %v1082_v45 = vrot.slane %v1081_v43, 2  ;;  %v1154_v37 = vld [vmem:[%s3265_s7 + $0x40] sm:$0xff] }
 0x351   :  { %v2235_v40 = vpack.c.bf16 %v1155_v38, %v1154_v37 }
 0x352   :  { %v1055_v41 = vrot.slane %v1054_v44, 1  ;;  %v1083_v49 = vadd.f32 %v1082_v45, %v1081_v43 }
 0x354   :  { %v1056_v50 = vadd.f32 %v1055_v41, %v1054_v44  ;;  %v1084_v51 = vrot.slane %v1083_v49, 1 }
 0x356   :  { %v1085_v52 = vadd.f32 %v1084_v51, %v1083_v49  ;;  %v1086_v54 = vmul.f32 0.016129032, %v1056_v50 }
 0x358   :  { %v1087_v57 = vmul.f32 0.016129032, %v1085_v52  ;;  %v1088_v60 = vmul.f32 %v1086_v54, %v1086_v54 }
 0x35a   :  { %v1089_v61 = vsub.f32 %v1087_v57, %v1088_v60  ;;  %v1157_v57 = vld [vmem:[%s3265_s7 + $0x58] sm:$0xff] }
 0x35c   :  { %v1090_v62 = vmax.f32 %v1089_v61, 0.0 }
 0x35e   :  { %v1091_v53 = vadd.f32 1e-05, %v1090_v62 }
 0x360   :  { %2312 = vrsqrt.f32 %v1091_v53 }
 0x36a   :  { %v2313_v1 = vpop.eup %2312 }
 0x36b   :  { %v1093_v47 = vmul.f32 %v2313_v1, %v756_v63 }
 0x36d   :  { %v1094_v3 = vmul.f32 %v1093_v47, %v1086_v54  ;;  %v1099_v39 = vrot.slane %v1093_v47, %v2825_v48  ;;  %v1156_v54 = vld [vmem:[%s3265_s7 + $0x50] sm:$0xff] }
 0x36e   :  { %v2239_v60 = vpack.c.bf16 %v1157_v57, %v1156_v54 }
 0x36f   :  { %v1095_v36 = vsub.f32 %v757_v46, %v1094_v3  ;;  %v1106_v4 = vmul.f32 %v1099_v39, %v1027_v21  ;;  %v1102_v15 = vmul.f32 %v1099_v39, %v1007_v16  ;;  %v1103_v5 = vmul.f32 %v2991_v59, %v1099_v39 }
 0x370   :  { %v1100_v58 = vmul.f32 %v1099_v39, %v2983_v0  ;;  %v1101_v28 = vmul.f32 %v2977_v2, %v1099_v39  ;;  %v1104_v6 = vmul.f32 %v1099_v39, %v1017_v9  ;;  %v1105_v27 = vmul.f32 %v2084_v8, %v1099_v39 }
 0x371   :  { %v1112_v56 = vrot.slane %v1095_v36, %v2825_v48  ;;  %v1107_v7 = vmul.f32 %v2087_v18, %v1099_v39  ;;  %v1150_v18 = vld [vmem:[%s3265_s7 + $0x20] sm:$0xff] }
 0x372   :  { %v2227_v31 = vpack.c.bf16 %v1151_v23, %v1150_v18 }
 0x373   :  { %v1120_v55 = vadd.f32 %v1112_v56, %v1106_v4  ;;  %v1116_v42 = vadd.f32 %v1112_v56, %v1102_v15  ;;  %v1117_v10 = vadd.f32 %v1112_v56, %v1103_v5  ;;  %v1114_v11 = vadd.f32 %v1112_v56, %v1100_v58 }
 0x374   :  { %v1115_v12 = vadd.f32 %v1112_v56, %v1101_v28  ;;  %v1118_v13 = vadd.f32 %v1112_v56, %v1104_v6  ;;  %v1119_v14 = vadd.f32 %v1112_v56, %v1105_v27  ;;  %v1121_v17 = vadd.f32 %v1112_v56, %v1107_v7  ;;  %2228 = vmatprep.subr.bf16.mxu0 %v2227_v31  ;;  %v1398_v27 = vld [vmem:[%s3268_s10] sm:$0xff]  ;;  %v1399_v56 = vld [vmem:[%s3268_s10 + $0x8] sm:$0xff]  ;;  %v1400_v7 = vld [vmem:[%s3268_s10 + $0x10] sm:$0xff] }
 0x375   :  { %v1128_v16 = vmul.f32 0.01, %v1120_v55  ;;  %v1124_v19 = vmul.f32 0.01, %v1116_v42  ;;  %v1125_v59 = vmul.f32 0.01, %v1117_v10  ;;  %2230 = vmatpush3.bf16.msra.mxu0 %v2227_v31 }
 0x376   :  { %v1122_v20 = vmul.f32 0.01, %v1114_v11  ;;  %v1123_v0 = vmul.f32 0.01, %v1115_v12  ;;  %v1126_v21 = vmul.f32 0.01, %v1118_v13  ;;  %2232 = vmatprep.subr.bf16.mxu0 %v2231_v35 }
 0x377   :  { %v1136_v2 = vmax.f32 %v1120_v55, %v1128_v16  ;;  %v1132_v9 = vmax.f32 %v1116_v42, %v1124_v19  ;;  %v1133_v8 = vmax.f32 %v1117_v10, %v1125_v59  ;;  %v1127_v22 = vmul.f32 0.01, %v1119_v14  ;;  %v1401_v42 = vld [vmem:[%s3268_s10 + $0x18] sm:$0xff] }
 0x378   :  { %v1130_v24 = vmax.f32 %v1114_v11, %v1122_v20  ;;  %v1131_v25 = vmax.f32 %v1115_v12, %v1123_v0  ;;  %v1134_v26 = vmax.f32 %v1118_v13, %v1126_v21  ;;  %v1129_v29 = vmul.f32 0.01, %v1121_v17  ;;  %v1402_v11 = vld [vmem:[%s3268_s10 + $0x20] sm:$0xff]  ;;  %v1403_v12 = vld [vmem:[%s3268_s10 + $0x28] sm:$0xff] }
 0x379   :  { %1144 = vst.msk [vmem:[#allocation5 + $0x30] sm:$0xff] %vm552_vm7, %v1136_v2  ;;  %1140 = vst.msk [vmem:[#allocation5 + $0x10] sm:$0xff] %vm552_vm7, %v1132_v9  ;;  %v1135_v30 = vmax.f32 %v1119_v14, %v1127_v22  ;;  %2234 = vmatpush3.bf16.msra.mxu0 %v2231_v35  ;;  %v2243_v55 = vpack.c.bf16 %v1399_v56, %v1398_v27  ;;  %v2247_v10 = vpack.c.bf16 %v1401_v42, %v1400_v7 }
 0x37a   :  { %1141 = vst.msk [vmem:[#allocation5 + $0x18] sm:$0xff] %vm552_vm7, %v1133_v8  ;;  %1138 = vst.msk [vmem:[#allocation5] sm:$0xff] %vm552_vm7, %v1130_v24  ;;  %v1137_v34 = vmax.f32 %v1121_v17, %v1129_v29  ;;  %2236 = vmatprep.subr.bf16.mxu0 %v2235_v40  ;;  %v2251_v13 = vpack.c.bf16 %v1403_v12, %v1402_v11  ;;  %v1404_v11 = vld [vmem:[%s3268_s10 + $0x30] sm:$0xff]  ;;  %v1405_v12 = vld [vmem:[%s3268_s10 + $0x38] sm:$0xff] }
 0x37b   :  { %1139 = vst.msk [vmem:[#allocation5 + $0x8] sm:$0xff] %vm552_vm7, %v1131_v25  ;;  %1142 = vst.msk [vmem:[#allocation5 + $0x20] sm:$0xff] %vm552_vm7, %v1134_v26  ;;  %2244 = vmatprep.subr.bf16.mxu1 %v2243_v55 }
 0x37c   :  { %1143 = vst.msk [vmem:[#allocation5 + $0x28] sm:$0xff] %vm552_vm7, %v1135_v30  ;;  %2246 = vmatpush3.bf16.msra.mxu1 %v2243_v55 }
 0x37d   :  { %1145 = vst.msk [vmem:[#allocation5 + $0x38] sm:$0x3f] %vm582_vm8, %v1137_v34  ;;  %2238 = vmatpush3.bf16.msra.mxu0 %v2235_v40  ;;  %2248 = vmatprep.subr.bf16.mxu1 %v2247_v10 }
 0x37e   :  { %2240 = vmatprep.subr.bf16.mxu0 %v2239_v60 }
 0x380   :  { %2250 = vmatpush3.bf16.msra.mxu1 %v2247_v10 }
 0x381   :  { %v1168_v43 = vld [vmem:[#allocation5 + $0x11] ss:$2 sm:$0x7f]  ;;  %v1162_v50 = vld [vmem:[#allocation5 + $0x10] ss:$2 sm:$0x7f]  ;;  %2242 = vmatpush3.bf16.msra.mxu0 %v2239_v60  ;;  %2252 = vmatprep.subr.bf16.mxu1 %v2251_v13 }
 0x382   :  { %1173 = vrot.lane.b32.xlu1 %v1168_v43, %s2346_s22  ;;  %v1166_v44 = vld [vmem:[#allocation5 + $0x1] ss:$2 sm:$0xff]  ;;  %v1160_v45 = vld [vmem:[#allocation5] ss:$2 sm:$0xff]  ;;  %1164 = vst.msk [vmem:[#allocation6 + $0x8] sm:$0x7f] %vm768_vm9, %v1162_v50 }
 0x383   :  { %1171 = vrot.lane.b32.xlu0 %v1166_v44, %s2346_s22  ;;  %1163 = vst.msk [vmem:[#allocation6] sm:$0xff] %vm552_vm7, %v1160_v45  ;;  %v1194_v41 = vld [vmem:[#allocation5 + $0x1f] ss:$2 sm:$0xff]  ;;  %v1200_v49 = vld [vmem:[#allocation5 + $0x20] ss:$2 sm:$0xff] }
 0x384   :  { %1197 = vst.msk [vmem:[#allocation6 + $0xf] sm:$0xff] %vm552_vm7, %v1194_v41  ;;  %v1196_v51 = vld [vmem:[#allocation5 + $0x2f] ss:$2 sm:$0x7f]  ;;  %v1180_v52 = vld [vmem:[#allocation5 + $0x2] ss:$2 sm:$0xff]  ;;  %2254 = vmatpush3.bf16.msra.mxu1 %v2251_v13 }
 0x385   :  { %1198 = vst.msk [vmem:[#allocation6 + $0x17] sm:$0x7f] %vm768_vm9, %v1196_v51  ;;  %v1214_v61 = vld [vmem:[#allocation5 + $0x21] ss:$2 sm:$0xff] }
 0x386   :  { %1205 = vrot.lane.b32.xlu1 %v1200_v49, %s2346_s22  ;;  %v1182_v62 = vld [vmem:[#allocation5 + $0x12] ss:$2 sm:$0x7f]  ;;  %v1216_v53 = vld [vmem:[#allocation5 + $0x31] ss:$2 sm:$0x7f] }
 0x387   :  { %1185 = vrot.lane.b32.xlu0 %v1180_v52, %s2347_s4  ;;  %v1202_v63 = vld [vmem:[#allocation5 + $0x30] ss:$2 sm:$0x7f] }
 0x38a   :  { %1219 = vrot.lane.b32.xlu1 %v1214_v61, %s2347_s4 }
 0x38b   :  { %1187 = vrot.lane.b32.xlu0 %v1182_v62, %s2347_s4 }
 0x38e   :  { %1221 = vrot.lane.b32.xlu1 %v1216_v53, %s2347_s4  ;;  %v1158_v53 = vld [vmem:[%s3266_s8] sm:$0x1] }
 0x38f   :  { %1207 = vrot.lane.b32.xlu0 %v1202_v63, %s2346_s22 }
 0x3f4   :  { %v1174_v1 = vpop.permute.xlu1 %1173 }
 0x3f5   :  { %1178 = vst.msk [vmem:[#allocation6 + $0x8] sm:$0x7f] %vm798_vm12, %v1174_v1  ;;  %v1172_v47 = vpop.permute.xlu0 %1171 }
 0x3f6   :  { %1177 = vst.msk [vmem:[#allocation6] sm:$0xff] %vm794_vm10, %v1172_v47  ;;  %v1159_v47 = vld [vmem:[%s3267_s9] sm:$0x1] }
 0x3f8   :  { %v1206_v46 = vpop.permute.xlu1 %1205 }
 0x3f9   :  { %1211 = vst.msk [vmem:[#allocation6 + $0xf] sm:$0xff] %vm794_vm10, %v1206_v46  ;;  %v1186_v3 = vpop.permute.xlu0 %1185 }
 0x3fa   :  { %1191 = vst.msk [vmem:[#allocation6] sm:$0xff] %vm824_vm11, %v1186_v3 }
 0x3fc   :  { %v1220_v39 = vpop.permute.xlu1 %1219 }
 0x3fd   :  { %1225 = vst.msk [vmem:[#allocation6 + $0xf] sm:$0xff] %vm824_vm11, %v1220_v39  ;;  %v1188_v36 = vpop.permute.xlu0 %1187 }
 0x3fe   :  { %1192 = vst.msk [vmem:[#allocation6 + $0x8] sm:$0x7f] %vm828_vm14, %v1188_v36 }
 0x400   :  { %v1222_v4 = vpop.permute.xlu1 %1221 }
 0x401   :  { %v1208_v15 = vpop.permute.xlu0 %1207  ;;  %v1227_v5 = vld [vmem:[#allocation6] sm:$0xff] }
 0x402   :  { %1212 = vst.msk [vmem:[#allocation6 + $0x17] sm:$0x7f] %vm798_vm12, %v1208_v15  ;;  %2112 = vmatprep.mubr.msk.f32.mxu0 %vm906_vm13, %v1227_v5 }
 0x403   :  { %1226 = vst.msk [vmem:[#allocation6 + $0x17] sm:$0x7f] %vm828_vm14, %v1222_v4 }
 0x405   :  { %v1228_v58 = vld [vmem:[#allocation6 + $0x8] sm:$0xff] }
 0x406   :  { %2113 = vmatmul.mubr.msk.f32.vlgmr.msra.gmra.mrb[12].mxu0 %vm906_vm13, %v1228_v58 }
 0x40a   :  { %v1229_v28 = vld [vmem:[#allocation6 + $0x10] sm:$0xff]  ;;  %v1230_v6 = vld [vmem:[#allocation6 + $0x18] sm:$0x3f] }
 0x40b   :  { %2115 = vmatprep.mubr.msk.f32.mxu0 %vm906_vm13, %v1229_v28 }
 0x40c   :  { %2116 = vmatmul.mubr.msk.f32.gmra.mrb[14].mxu0 %vm906_vm13, %v1230_v6 }
 0x4d9   :  { %v2114_v14 = vpop.f32.mrb[12].mxu0 }
 0x4da   :  { %v1329_v17 = vsel %vm552_vm7, %v2114_v14, 0.0  ;;  %v1342_v16 = vmul.f32 %v2114_v14, %v2114_v14  ;;  %v1309_v19 = vpop.f32.mrb[13].mxu0 }
 0x4db   :  { %v1328_v59 = vsel %vm552_vm7, %v1309_v19, 0.0  ;;  %v1341_v20 = vmul.f32 %v1309_v19, %v1309_v19 }
 0x4dc   :  { %v1346_v0 = vsel %vm552_vm7, %v1342_v16, 0.0  ;;  %v1330_v21 = vadd.f32 %v1329_v17, %v1328_v59  ;;  %v2255_v16 = vpack.c.bf16 %v1405_v12, %v1404_v11  ;;  %v1406_v59 = vld [vmem:[%s3268_s10 + $0x40] sm:$0xff] }
 0x4dd   :  { %v1345_v2 = vsel %vm552_vm7, %v1341_v20, 0.0  ;;  %v1407_v20 = vld [vmem:[%s3268_s10 + $0x48] sm:$0xff] }
 0x4de   :  { %v1347_v9 = vadd.f32 %v1346_v0, %v1345_v2  ;;  %2256 = vmatprep.subr.bf16.mxu1 %v2255_v16  ;;  %v1408_v0 = vld [vmem:[%s3268_s10 + $0x50] sm:$0xff]  ;;  %v1409_v2 = vld [vmem:[%s3268_s10 + $0x58] sm:$0xff] }
 0x4df   :  { %v2117_v8 = vpop.f32.mrb[14].mxu0  ;;  %2258 = vmatpush3.bf16.msra.mxu1 %v2255_v16 }
 0x4e0   :  { %v1319_v22 = vpop.f32.mrb[15].mxu0  ;;  %v1344_v18 = vmul.f32 %v2117_v8, %v2117_v8  ;;  %v1333_v26 = vsel %vm582_vm8, %v2117_v8, 0.0 }
 0x4e1   :  { %v1331_v23 = vsel %vm552_vm7, %v1319_v22, 0.0  ;;  %v1343_v24 = vmul.f32 %v1319_v22, %v1319_v22 }
 0x4e2   :  { %v1332_v25 = vadd.f32 %v1331_v23, %v1330_v21  ;;  %v1350_v32 = vsel %vm582_vm8, %v1344_v18, 0.0  ;;  %v2259_v21 = vpack.c.bf16 %v1407_v20, %v1406_v59 }
 0x4e3   :  { %v1348_v29 = vsel %vm552_vm7, %v1343_v24, 0.0 }
 0x4e4   :  { %v1334_v30 = vadd.f32 %v1333_v26, %v1332_v25  ;;  %v1349_v31 = vadd.f32 %v1348_v29, %v1347_v9  ;;  %v2263_v9 = vpack.c.bf16 %v1409_v2, %v1408_v0  ;;  %2260 = vmatprep.subr.bf16.mxu1 %v2259_v21 }
 0x4e5   :  { %2262 = vmatpush3.bf16.msra.mxu1 %v2259_v21 }
 0x4e6   :  { %v1335_v33 = vrot.slane %v1334_v30, 4  ;;  %v1351_v34 = vadd.f32 %v1350_v32, %v1349_v31  ;;  %2264 = vmatprep.subr.bf16.mxu1 %v2263_v9 }
 0x4e8   :  { %v1336_v35 = vadd.f32 %v1335_v33, %v1334_v30  ;;  %v1352_v37 = vrot.slane %v1351_v34, 4 }
 0x4e9   :  { %2266 = vmatpush3.bf16.msra.mxu1 %v2263_v9 }
 0x4ea   :  { %v1337_v38 = vrot.slane %v1336_v35, 2  ;;  %v1353_v40 = vadd.f32 %v1352_v37, %v1351_v34  ;;  %v1578_v34 = vld [vmem:[%s3271_s13] sm:$0xff]  ;;  %v1580_v37 = vld [vmem:[%s3271_s13 + $0x10] sm:$0xff] }
 0x4ec   :  { %v1338_v43 = vadd.f32 %v1337_v38, %v1336_v35  ;;  %v1354_v44 = vrot.slane %v1353_v40, 2  ;;  %v1579_v35 = vld [vmem:[%s3271_s13 + $0x8] sm:$0xff]  ;;  %v2348_v38 = vmov 0.0|0.0  }
 0x4ed   :  { %2267 = vmatprep.subr.bf16.mxu0 %v2348_v38  ;;  %2291 = vmatprep.subr.bf16.mxu1 %v2348_v38 }
 0x4ee   :  { %v1339_v45 = vrot.slane %v1338_v43, 1  ;;  %v1355_v41 = vadd.f32 %v1354_v44, %v1353_v40  ;;  %v2268_v40 = vpack.c.bf16 %v1579_v35, %v1578_v34  ;;  %v1590_v34 = vld [vmem:[%s3271_s13 + $0x60] sm:$0xff]  ;;  %v1591_v35 = vld [vmem:[%s3271_s13 + $0x68] sm:$0xff] }
 0x4f0   :  { %v1340_v49 = vadd.f32 %v1339_v45, %v1338_v43  ;;  %v1356_v50 = vrot.slane %v1355_v41, 1  ;;  %v1581_v43 = vld [vmem:[%s3271_s13 + $0x18] sm:$0xff]  ;;  %2269 = vmatpush3.bf16.msra.mxu0 %v2268_v40  ;;  %v1582_v45 = vld [vmem:[%s3271_s13 + $0x20] sm:$0xff]  ;;  %v2286_v40 = vpack.c.bf16 %v1591_v35, %v1590_v34 }
 0x4f1   :  { %v2271_v44 = vpack.c.bf16 %v1581_v43, %v1580_v37  ;;  %2270 = vmatprep.subr.bf16.mxu0 %v2348_v38  ;;  %v1592_v37 = vld [vmem:[%s3271_s13 + $0x70] sm:$0xff]  ;;  %v1593_v43 = vld [vmem:[%s3271_s13 + $0x78] sm:$0xff]  ;;  %v1929_v35 = vld [vmem:[%s3275_s17] ss:$0 sm:$0xff] }
 0x4f2   :  { %v1357_v51 = vadd.f32 %v1356_v50, %v1355_v41  ;;  %v1358_v52 = vmul.f32 0.033333335, %v1340_v49  ;;  %v1583_v41 = vld [vmem:[%s3271_s13 + $0x28] sm:$0xff]  ;;  %v1584_v50 = vld [vmem:[%s3271_s13 + $0x30] sm:$0xff] }
 0x4f3   :  { %v2274_v49 = vpack.c.bf16 %v1583_v41, %v1582_v45  ;;  %v2289_v45 = vpack.c.bf16 %v1593_v43, %v1592_v37 }
 0x4f4   :  { %v1359_v54 = vmul.f32 0.033333335, %v1357_v51  ;;  %v1360_v57 = vmul.f32 %v1358_v52, %v1358_v52  ;;  %2272 = vmatpush3.bf16.msra.mxu0 %v2271_v44  ;;  %v1585_v51 = vld [vmem:[%s3271_s13 + $0x38] sm:$0xff]  ;;  %v2350_v44 = vmov 0.0  }
 0x4f5   :  { %2273 = vmatprep.subr.bf16.mxu0 %v2348_v38  ;;  %2177 = vmatprep.mubr.msk.f32.mxu0 %vm2349_vm15, %v2350_v44 }
 0x4f6   :  { %v1361_v60 = vsub.f32 %v1359_v54, %v1360_v57 }
 0x4f8   :  { %v1362_v61 = vmax.f32 %v1361_v60, 0.0  ;;  %2275 = vmatpush3.bf16.msra.mxu0 %v2274_v49 }
 0x4f9   :  { %2276 = vmatprep.subr.bf16.mxu0 %v2348_v38 }
 0x4fa   :  { %v1363_v62 = vadd.f32 1e-05, %v1362_v61 }
 0x4fc   :  { %2314 = vrsqrt.f32 %v1363_v62 }
 0x506   :  { %v2315_v63 = vpop.eup %2314 }
 0x507   :  { %v1365_v1 = vmul.f32 %v2315_v63, %v1158_v53 }
 0x509   :  { %v1366_v46 = vmul.f32 %v1365_v1, %v1358_v52  ;;  %v1371_v3 = vrot.slane %v1365_v1, %v2825_v48  ;;  %v2277_v52 = vpack.c.bf16 %v1585_v51, %v1584_v50 }
 0x50b   :  { %v1367_v39 = vsub.f32 %v1159_v47, %v1366_v46  ;;  %v1372_v36 = vmul.f32 %v1371_v3, %v1309_v19  ;;  %v1373_v4 = vmul.f32 %v2114_v14, %v1371_v3  ;;  %v1374_v15 = vmul.f32 %v1371_v3, %v1319_v22  ;;  %2278 = vmatpush3.bf16.msra.mxu0 %v2277_v52 }
 0x50c   :  { %v1375_v5 = vmul.f32 %v2117_v8, %v1371_v3  ;;  %2279 = vmatprep.subr.bf16.mxu0 %v2348_v38 }
 0x50d   :  { %v1380_v58 = vrot.slane %v1367_v39, %v2825_v48 }
 0x50f   :  { %v1382_v28 = vadd.f32 %v1380_v58, %v1372_v36  ;;  %v1383_v6 = vadd.f32 %v1380_v58, %v1373_v4  ;;  %v1384_v27 = vadd.f32 %v1380_v58, %v1374_v15  ;;  %v1385_v56 = vadd.f32 %v1380_v58, %v1375_v5 }
 0x511   :  { %v1386_v7 = vmul.f32 0.01, %v1382_v28  ;;  %v1387_v55 = vmul.f32 0.01, %v1383_v6  ;;  %v1388_v42 = vmul.f32 0.01, %v1384_v27 }
 0x512   :  { %v1389_v10 = vmul.f32 0.01, %v1385_v56 }
 0x513   :  { %v1390_v13 = vmax.f32 %v1382_v28, %v1386_v7  ;;  %v1391_v14 = vmax.f32 %v1383_v6, %v1387_v55  ;;  %v1392_v17 = vmax.f32 %v1384_v27, %v1388_v42 }
 0x514   :  { %v1393_v19 = vmax.f32 %v1385_v56, %v1389_v10 }
 0x515   :  { %1394 = vst.msk [vmem:[#allocation7] sm:$0xff] %vm552_vm7, %v1390_v13  ;;  %1395 = vst.msk [vmem:[#allocation7 + $0x8] sm:$0xff] %vm552_vm7, %v1391_v14  ;;  %v1410_v14 = vld [vmem:[%s3269_s11] sm:$0x1] }
 0x516   :  { %1396 = vst.msk [vmem:[#allocation7 + $0x10] sm:$0xff] %vm552_vm7, %v1392_v17 }
 0x517   :  { %1397 = vst.msk [vmem:[#allocation7 + $0x18] sm:$0x3f] %vm582_vm8, %v1393_v19  ;;  %v1411_v19 = vld [vmem:[%s3270_s12] sm:$0x1] }
 0x51c   :  { %v1415_v8 = vld [vmem:[#allocation7 + $0x1] ss:$2 sm:$0x7f]  ;;  %v1412_v23 = vld [vmem:[#allocation7] ss:$2 sm:$0x7f] }
 0x51d   :  { %1417 = vrot.lane.b32.xlu0 %v1415_v8, %s2346_s22  ;;  %1413 = vst.msk [vmem:[#allocation8] sm:$0x7f] %vm768_vm9, %v1412_v23  ;;  %v1422_v24 = vld [vmem:[#allocation7 + $0x2] ss:$2 sm:$0x7f] }
 0x51e   :  { %v1432_v22 = vld [vmem:[#allocation7 + $0x10] ss:$2 sm:$0x7f]  ;;  %v1429_v18 = vld [vmem:[#allocation7 + $0xf] ss:$2 sm:$0x7f] }
 0x51f   :  { %1434 = vrot.lane.b32.xlu1 %v1432_v22, %s2346_s22  ;;  %1430 = vst.msk [vmem:[#allocation8 + $0x7] sm:$0x7f] %vm768_vm9, %v1429_v18  ;;  %v1439_v25 = vld [vmem:[#allocation7 + $0x11] ss:$2 sm:$0x7f]  ;;  %v1586_v18 = vld [vmem:[%s3271_s13 + $0x40] sm:$0xff] }
 0x520   :  { %v1587_v23 = vld [vmem:[%s3271_s13 + $0x48] sm:$0xff] }
 0x521   :  { %1424 = vrot.lane.b32.xlu0 %v1422_v24, %s2347_s4 }
 0x523   :  { %1441 = vrot.lane.b32.xlu1 %v1439_v25, %s2347_s4 }
 0x58f   :  { %v1418_v26 = vpop.permute.xlu0 %1417 }
 0x590   :  { %1420 = vst.msk [vmem:[#allocation8] sm:$0x7f] %vm798_vm12, %v1418_v26  ;;  %v2280_v26 = vpack.c.bf16 %v1587_v23, %v1586_v18  ;;  %v1595_v23 = vld [vmem:[%s3273_s15] sm:$0x1]  ;;  %s2352_s15 = smov [#allocation12]  }
 0x591   :  { %v1435_v29 = vpop.permute.xlu1 %1434  ;;  %s1844_s29 = sshll.u32 %s2352_s15, 4  ;;  %s1845_s29 = int_to_ptr.vmem [resolvable:$true] %s1844_s29 }
 0x592   :  { %1437 = vst.msk [vmem:[#allocation8 + $0x7] sm:$0x7f] %vm798_vm12, %v1435_v29  ;;  %2281 = vmatpush3.bf16.msra.mxu0 %v2280_v26  ;;  %s2320_s12 = scalar_lea.vmem %s1845_s29, 128  ;;  %p2325_p1 = scmp.lt.s32.totalorder %s1845_s29, %s1845_s29 }
 0x593   :  { %v1425_v30 = vpop.permute.xlu0 %1424  ;;  %2282 = vmatprep.subr.bf16.mxu0 %v2348_v38  ;;  %p2321_p0 = scmp.ne.s32.totalorder %s1845_s29, %s2320_s12  ;;  %p2326_p2 = scmp.lt.s32.totalorder %s2320_s12, %s2320_s12 }
 0x594   :  { %1427 = vst.msk [vmem:[#allocation8] sm:$0x7f] %vm828_vm14, %v1425_v30 }
 0x595   :  { %v1442_v31 = vpop.permute.xlu1 %1441  ;;  %p2327_p3 = por %p2326_p2, %p2325_p1 }
 0x596   :  { %1444 = vst.msk [vmem:[#allocation8 + $0x7] sm:$0x7f] %vm828_vm14, %v1442_v31  ;;  %v1588_v31 = vld [vmem:[%s3271_s13 + $0x50] sm:$0xff] }
 0x597   :  { %p2328_p4 = pnand %p2327_p3, %p2321_p0 }
 0x59d   :  { %v1445_v32 = vld [vmem:[#allocation8] sm:$0xff]  ;;  %v1446_v33 = vld [vmem:[#allocation8 + $0x8] sm:$0x3f] }
 0x59e   :  { %2142 = vmatprep.mubr.msk.f32.mxu1 %vm906_vm13, %v1445_v32  ;;  %v1589_v32 = vld [vmem:[%s3271_s13 + $0x58] sm:$0xff]  ;;  %s2351_s13 = smov 96  }
 0x59f   :  { %2143 = vmatmul.mubr.msk.f32.vlgmr.msra.gmra.mrb[12].mxu1 %vm906_vm13, %v1446_v33  ;;  %v2283_v33 = vpack.c.bf16 %v1589_v32, %v1588_v31 }
 0x5a0   :  { %2188 = vmatprep.mubr.msk.f32.mxu1 %vm2349_vm15, %v2350_v44 }
 0x5a1   :  { %2284 = vmatpush3.bf16.msra.mxu0 %v2283_v33 }
 0x5a2   :  { %2285 = vmatprep.subr.bf16.mxu0 %v2348_v38 }
 0x5a5   :  { %2287 = vmatpush3.bf16.msra.mxu0 %v2286_v40 }
 0x5a6   :  { %2288 = vmatprep.subr.bf16.mxu0 %v2348_v38 }
 0x5a9   :  { %2290 = vmatpush3.bf16.msra.mxu0 %v2289_v45 }
 0x672   :  { %v2144_v54 = vpop.f32.mrb[12].mxu1 }
 0x673   :  { %v1529_v57 = vsel %vm582_vm8, %v2144_v54, 0.0  ;;  %v1538_v60 = vmul.f32 %v2144_v54, %v2144_v54  ;;  %v1519_v61 = vpop.f32.mrb[13].mxu1 }
 0x674   :  { %v1528_v62 = vsel %vm552_vm7, %v1519_v61, 0.0  ;;  %v1537_v53 = vmul.f32 %v1519_v61, %v1519_v61 }
 0x675   :  { %v1540_v63 = vsel %vm582_vm8, %v1538_v60, 0.0  ;;  %v1530_v1 = vadd.f32 %v1529_v57, %v1528_v62 }
 0x676   :  { %v1539_v47 = vsel %vm552_vm7, %v1537_v53, 0.0 }
 0x677   :  { %v1531_v46 = vrot.slane %v1530_v1, 4  ;;  %v1541_v3 = vadd.f32 %v1540_v63, %v1539_v47 }
 0x679   :  { %v1532_v39 = vadd.f32 %v1531_v46, %v1530_v1  ;;  %v1542_v36 = vrot.slane %v1541_v3, 4 }
 0x67b   :  { %v1533_v4 = vrot.slane %v1532_v39, 2  ;;  %v1543_v15 = vadd.f32 %v1542_v36, %v1541_v3  ;;  %v1751_v3 = vld [vmem:[%s3274_s16] sm:$0xff]  ;;  %v1753_v36 = vld [vmem:[%s3274_s16 + $0x10] sm:$0xff] }
 0x67d   :  { %v1534_v5 = vadd.f32 %v1533_v4, %v1532_v39  ;;  %v1544_v58 = vrot.slane %v1543_v15, 2  ;;  %v1752_v39 = vld [vmem:[%s3274_s16 + $0x8] sm:$0xff] }
 0x67e   :  { %v2292_v4 = vpack.c.bf16 %v1752_v39, %v1751_v3 }
 0x67f   :  { %v1535_v28 = vrot.slane %v1534_v5, 1  ;;  %v1545_v6 = vadd.f32 %v1544_v58, %v1543_v15  ;;  %v1754_v15 = vld [vmem:[%s3274_s16 + $0x18] sm:$0xff] }
 0x680   :  { %2293 = vmatpush3.bf16.msra.mxu1 %v2292_v4 }
 0x681   :  { %v1536_v27 = vadd.f32 %v1535_v28, %v1534_v5  ;;  %v1546_v56 = vrot.slane %v1545_v6, 1  ;;  %v2295_v5 = vpack.c.bf16 %v1754_v15, %v1753_v36  ;;  %2294 = vmatprep.subr.bf16.mxu1 %v2348_v38 }
 0x683   :  { %v1547_v7 = vadd.f32 %v1546_v56, %v1545_v6  ;;  %v1548_v55 = vmul.f32 0.071428575, %v1536_v27 }
 0x684   :  { %2296 = vmatpush3.bf16.msra.mxu1 %v2295_v5 }
 0x685   :  { %v1549_v42 = vmul.f32 0.071428575, %v1547_v7  ;;  %v1550_v10 = vmul.f32 %v1548_v55, %v1548_v55 }
 0x687   :  { %v1551_v11 = vsub.f32 %v1549_v42, %v1550_v10 }
 0x689   :  { %v1552_v12 = vmax.f32 %v1551_v11, 0.0 }
 0x68b   :  { %v1553_v13 = vadd.f32 1e-05, %v1552_v12 }
 0x68d   :  { %2316 = vrsqrt.f32 %v1553_v13 }
 0x697   :  { %v2317_v17 = vpop.eup %2316 }
 0x698   :  { %v1555_v16 = vmul.f32 %v2317_v17, %v1410_v14 }
 0x69a   :  { %v1556_v59 = vmul.f32 %v1555_v16, %v1548_v55  ;;  %v1561_v20 = vrot.slane %v1555_v16, %v2825_v48 }
 0x69c   :  { %v1557_v0 = vsub.f32 %v1411_v19, %v1556_v59  ;;  %v1562_v21 = vmul.f32 %v1561_v20, %v1519_v61  ;;  %v1563_v2 = vmul.f32 %v2144_v54, %v1561_v20 }
 0x69e   :  { %v1568_v9 = vrot.slane %v1557_v0, %v2825_v48 }
 0x6a0   :  { %v1570_v8 = vadd.f32 %v1568_v9, %v1562_v21  ;;  %v1571_v22 = vadd.f32 %v1568_v9, %v1563_v2 }
 0x6a2   :  { %v1572_v24 = vmul.f32 0.01, %v1570_v8  ;;  %v1573_v25 = vmul.f32 0.01, %v1571_v22 }
 0x6a4   :  { %v1574_v29 = vmax.f32 %v1570_v8, %v1572_v24  ;;  %v1575_v30 = vmax.f32 %v1571_v22, %v1573_v25  ;;  %v1594_v8 = vld [vmem:[%s3272_s14] sm:$0x1] }
 0x6a6   :  { %1576 = vst.msk [vmem:[#allocation9] sm:$0xff] %vm552_vm7, %v1574_v29 }
 0x6a7   :  { %1577 = vst.msk [vmem:[#allocation9 + $0x8] sm:$0x3f] %vm582_vm8, %v1575_v30 }
 0x6ad   :  { %v1599_v49 = vld [vmem:[#allocation9 + $0x1] sm:$0xf] }
 0x6ae   :  { %v1622_v41 = vld [vmem:[#allocation9 + $0x8] sm:$0xf]  ;;  %1601 = vrot.lane.b32.xlu0 %v1599_v49, %s2346_s22  ;;  %v1596_v51 = vld [vmem:[#allocation9] sm:$0xf] }
 0x6af   :  { %1624 = vrot.lane.b32.xlu1 %v1622_v41, %s2346_s22  ;;  %v1620_v50 = vld [vmem:[#allocation9 + $0x7] sm:$0xf]  ;;  %1598 = vst.msk [vmem:[#allocation10] sm:$0xf] %vm1597_vm0, %v1596_v51  ;;  %v1606_v54 = vld [vmem:[#allocation9 + $0x2] sm:$0xf] }
 0x6b0   :  { %1621 = vst.msk [vmem:[#allocation10 + $0x4] sm:$0xf] %vm1597_vm0, %v1620_v50  ;;  %v1628_v52 = vld [vmem:[#allocation9 + $0x9] sm:$0xf]  ;;  %v1613_v60 = vld [vmem:[#allocation9 + $0x3] sm:$0xf] }
 0x6b1   :  { %v1634_v57 = vld [vmem:[#allocation9 + $0xa] sm:$0xf] }
 0x6b2   :  { %1608 = vrot.lane.b32.xlu0 %v1606_v54, %s2347_s4 }
 0x6b3   :  { %1630 = vrot.lane.b32.xlu1 %v1628_v52, %s2347_s4 }
 0x6b6   :  { %1615 = vrot.lane.b32.xlu0 %v1613_v60, %s2351_s13 }
 0x6b7   :  { %1636 = vrot.lane.b32.xlu1 %v1634_v57, %s2351_s13 }
 0x720   :  { %v1602_v62 = vpop.permute.xlu0 %1601 }
 0x721   :  { %v1625_v61 = vpop.permute.xlu1 %1624  ;;  %1605 = vst.msk [vmem:[#allocation10] sm:$0xf] %vm1604_vm1, %v1602_v62 }
 0x722   :  { %1627 = vst.msk [vmem:[#allocation10 + $0x4] sm:$0xf] %vm1604_vm1, %v1625_v61 }
 0x724   :  { %v1609_v63 = vpop.permute.xlu0 %1608 }
 0x725   :  { %v1631_v53 = vpop.permute.xlu1 %1630  ;;  %1612 = vst.msk [vmem:[#allocation10] sm:$0xf] %vm1611_vm2, %v1609_v63 }
 0x726   :  { %1633 = vst.msk [vmem:[#allocation10 + $0x4] sm:$0xf] %vm1611_vm2, %v1631_v53 }
 0x728   :  { %v1616_v47 = vpop.permute.xlu0 %1615 }
 0x729   :  { %v1637_v1 = vpop.permute.xlu1 %1636  ;;  %1619 = vst.msk [vmem:[#allocation10] sm:$0xf] %vm1618_vm3, %v1616_v47 }
 0x72a   :  { %1639 = vst.msk [vmem:[#allocation10 + $0x4] sm:$0xf] %vm1618_vm3, %v1637_v1 }
 0x731   :  { %v1640_v46 = vld [vmem:[#allocation10] sm:$0xff] }
 0x732   :  { %2178 = vmatmul.mubr.f32.vlgmr.msra.gmra.mrb[16].mxu0 %v1640_v46 }
 0x805   :  { %v1707_v58 = vpop.f32.mrb[16].mxu0 }
 0x806   :  { %v1711_v28 = vsel %vm552_vm7, %v1707_v58, 0.0  ;;  %v1718_v6 = vmul.f32 %v1707_v58, %v1707_v58  ;;  %v2179_v27 = vpop.f32.mrb[17].mxu0 }
 0x807   :  { %v1712_v56 = vrot.slane %v1711_v28, 4 }
 0x808   :  { %v1719_v7 = vsel %vm552_vm7, %v1718_v6, 0.0 }
 0x809   :  { %v1713_v55 = vadd.f32 %v1712_v56, %v1711_v28  ;;  %v1720_v42 = vrot.slane %v1719_v7, 4 }
 0x80b   :  { %v1714_v10 = vrot.slane %v1713_v55, 2  ;;  %v1721_v11 = vadd.f32 %v1720_v42, %v1719_v7 }
 0x80d   :  { %v1715_v12 = vadd.f32 %v1714_v10, %v1713_v55  ;;  %v1722_v13 = vrot.slane %v1721_v11, 2 }
 0x80f   :  { %v1716_v14 = vrot.slane %v1715_v12, 1  ;;  %v1723_v17 = vadd.f32 %v1722_v13, %v1721_v11 }
 0x811   :  { %v1717_v16 = vadd.f32 %v1716_v14, %v1715_v12  ;;  %v1724_v19 = vrot.slane %v1723_v17, 1 }
 0x813   :  { %v1725_v38 = vadd.f32 %v1724_v19, %v1723_v17  ;;  %v1726_v59 = vmul.f32 0.125, %v1717_v16 }
 0x815   :  { %v1727_v20 = vmul.f32 0.125, %v1725_v38  ;;  %v1728_v0 = vmul.f32 %v1726_v59, %v1726_v59 }
 0x817   :  { %v1729_v21 = vsub.f32 %v1727_v20, %v1728_v0 }
 0x819   :  { %v1730_v2 = vmax.f32 %v1729_v21, 0.0 }
 0x81b   :  { %v1731_v9 = vadd.f32 1e-05, %v1730_v2 }
 0x81d   :  { %2318 = vrsqrt.f32 %v1731_v9 }
 0x827   :  { %v2319_v22 = vpop.eup %2318 }
 0x828   :  { %v1733_v18 = vmul.f32 %v2319_v22, %v1594_v8 }
 0x82a   :  { %v1734_v24 = vmul.f32 %v1733_v18, %v1726_v59  ;;  %v1739_v25 = vrot.slane %v1733_v18, %v2825_v48 }
 0x82c   :  { %v1735_v26 = vsub.f32 %v1595_v23, %v1734_v24  ;;  %v1740_v29 = vmul.f32 %v1739_v25, %v1707_v58 }
 0x82e   :  { %v1745_v30 = vrot.slane %v1735_v26, %v2825_v48 }
 0x830   :  { %v1747_v31 = vadd.f32 %v1745_v30, %v1740_v29 }
 0x832   :  { %v1748_v32 = vmul.f32 0.01, %v1747_v31 }
 0x834   :  { %v1749_v33 = vmax.f32 %v1747_v31, %v1748_v32 }
 0x836   :  { %1750 = vst.msk [vmem:[#allocation11] sm:$0xff] %vm552_vm7, %v1749_v33 }
 0x83d   :  { %v1756_v34 = vld [vmem:[#allocation11] sm:$0xff] }
 0x83e   :  { %2189 = vmatmul.mubr.msk.f32.vlgmr.msra.gmra.mrb[14].mxu1 %vm552_vm7, %v1756_v34 }
 0x911   :  { %v1832_v37 = vpop.f32.mrb[14].mxu1 }
 0x912   :  { %v1833_v40 = vadd.f32 %v1929_v35, %v1832_v37  ;;  %v2190_v43 = vpop.f32.mrb[15].mxu1 }
 0x914   :  { %1837 = vst.msk [vmem:[#allocation12] sm:$0xff] %vm1836_vm4, %v1833_v40 }
 0x915   :  { %2331 = shalt.err (!%p2328_p4)
}
 0x916   :  { %s2332_s1 = scalar_lea.hbm %s3276_s18, 128 }
 0x917   :  { %p2333_p5 = scmp.ne.s32.totalorder %s3276_s18, %s2332_s1  ;;  %p2336_p6 = scmp.lt.u32.totalorder %s2332_s1, %s3276_s18 }
 0x919   :  { %p2338_p7 = pnand %p2336_p6, %p2333_p5 }
 0x91b   :  { %2341 = shalt.err (!%p2338_p7)
}
 0x91c   :  { %1847 = dma.vmem_to_hbm [thread:$0]  %s1845_s29, 128, %s3276_s18, [#allocation13]  }
 0x91d   :  { %2342 = dma.done.wait [#allocation13], 128  }
 0x91e   :  { %2343 = vsyncadd [#allocation13], 4294967168 }
 0x91f   :  { %1851 = vsyncpa [#allocation13], 1 }

</bundles_post_ra>
